<compile_context>
chip_gen: v7x
topology: tpu7x:2x2x1
jax: 0.10.0
libtpu: 0.0.40
codegen_flags: <defaults>
</compile_context>

<pallas_src>
import functools

import jax
import jax.numpy as jnp
from jax import lax
from jax.experimental import pallas as pl
from jax.experimental.pallas import tpu as pltpu


# --------------------------------------------------------------------------
# tiling helpers
# --------------------------------------------------------------------------
def _round_up(x, m):
    return ((x + m - 1) // m) * m


def _pick_tile(size, preferred, align):
    """Largest tile <= preferred that is a multiple of `align` and divides
    `size`; falls back to the full extent (always a legal block shape)."""
    if size <= preferred:
        return size
    t = (preferred // align) * align
    while t >= align:
        if size % t == 0:
            return t
        t -= align
    return size


def _gelu_exact(y):
    # torch.nn.GELU default (erf formulation), computed in f32.
    return 0.5 * y * (1.0 + lax.erf(y * jnp.float32(0.7071067811865476)))


# --------------------------------------------------------------------------
# Pallas kernels
# --------------------------------------------------------------------------
def _ln_matmul_kernel(*refs, eps, activation, has_bias):
    # fused: y = act( LN(x) @ W (+ bias) )
    if has_bias:
        x_ref, g_ref, b_ref, w_ref, bias_ref, o_ref = refs
    else:
        x_ref, g_ref, b_ref, w_ref, o_ref = refs
        bias_ref = None
    x = x_ref[...].astype(jnp.float32)                  # [tm, K]
    mu = jnp.mean(x, axis=-1, keepdims=True)
    xc = x - mu
    var = jnp.mean(xc * xc, axis=-1, keepdims=True)
    h = xc * lax.rsqrt(var + eps) * g_ref[...] + b_ref[...]
    y = jnp.dot(h.astype(w_ref.dtype), w_ref[...],      # bf16 x bf16 -> f32
                preferred_element_type=jnp.float32)
    if bias_ref is not None:
        y = y + bias_ref[...]
    if activation == "gelu":
        y = _gelu_exact(y)
    o_ref[...] = y.astype(o_ref.dtype)


def pallas_ln_matmul(x, ln_g, ln_b, w, bias=None, activation=None,
                     out_dtype=jnp.bfloat16, eps=1e-5):
    M, K = x.shape
    K2, N = w.shape
    assert K == K2
    tm = _pick_tile(M, 256, 8)
    tn = _pick_tile(N, 512, 128)
    grid = (M // tm, N // tn)

    in_specs = [
        pl.BlockSpec((tm, K), lambda i, j: (i, 0)),
        pl.BlockSpec((1, K), lambda i, j: (0, 0)),
        pl.BlockSpec((1, K), lambda i, j: (0, 0)),
        pl.BlockSpec((K, tn), lambda i, j: (0, j)),
    ]
    args = [x,
            ln_g.reshape(1, K).astype(jnp.float32),
            ln_b.reshape(1, K).astype(jnp.float32),
            w]
    if bias is not None:
        in_specs.append(pl.BlockSpec((1, tn), lambda i, j: (0, j)))
        args.append(bias.reshape(1, N).astype(jnp.float32))

    kernel = functools.partial(_ln_matmul_kernel, eps=eps,
                               activation=activation, has_bias=bias is not None)
    return pl.pallas_call(
        kernel,
        out_shape=jax.ShapeDtypeStruct((M, N), out_dtype),
        grid=grid,
        in_specs=in_specs,
        out_specs=pl.BlockSpec((tm, tn), lambda i, j: (i, j)),
        compiler_params=pltpu.CompilerParams(
            dimension_semantics=("parallel", "parallel")),
    )(*args)


def _matmul_bias_residual_kernel(x_ref, w_ref, bias_ref, res_ref, o_ref):
    # fused: out = residual + (x @ W + b)
    y = jnp.dot(x_ref[...], w_ref[...], preferred_element_type=jnp.float32)
    y = y + bias_ref[...]
    o_ref[...] = (res_ref[...].astype(jnp.float32) + y).astype(o_ref.dtype)


def pallas_matmul_bias_residual(x, w, bias, res, out_dtype=jnp.float32):
    M, K = x.shape
    K2, N = w.shape
    assert K == K2 and res.shape == (M, N)
    tm = _pick_tile(M, 256, 8)
    tn = _pick_tile(N, 512, 128)
    grid = (M // tm, N // tn)
    return pl.pallas_call(
        _matmul_bias_residual_kernel,
        out_shape=jax.ShapeDtypeStruct((M, N), out_dtype),
        grid=grid,
        in_specs=[
            pl.BlockSpec((tm, K), lambda i, j: (i, 0)),
            pl.BlockSpec((K, tn), lambda i, j: (0, j)),
            pl.BlockSpec((1, tn), lambda i, j: (0, j)),
            pl.BlockSpec((tm, tn), lambda i, j: (i, j)),
        ],
        out_specs=pl.BlockSpec((tm, tn), lambda i, j: (i, j)),
        compiler_params=pltpu.CompilerParams(
            dimension_semantics=("parallel", "parallel")),
    )(x, w, bias.reshape(1, N).astype(jnp.float32), res)


def _attend_heads(q, k, v, *, dh, n_real, scale, col_ids):
    # q/k/v: [Np, nh*dh] (nh heads packed along lanes). softmax over real keys.
    nheads = q.shape[-1] // dh
    outs = []
    for h in range(nheads):
        sl = slice(h * dh, (h + 1) * dh)
        qh = (q[:, sl].astype(jnp.float32) * scale).astype(k.dtype)
        s = jnp.dot(qh, k[:, sl].T, preferred_element_type=jnp.float32)
        s = jnp.where(col_ids < n_real, s, jnp.float32(-1e30))
        m = jnp.max(s, axis=-1, keepdims=True)
        p = jnp.exp(s - m)
        l = jnp.sum(p, axis=-1, keepdims=True)
        p = p * pl.reciprocal(l, approx=True)
        outs.append(jnp.dot(p.astype(v.dtype), v[:, sl],
                            preferred_element_type=jnp.float32))
    return jnp.concatenate(outs, axis=-1) if len(outs) > 1 else outs[0]


def _attn_kernel(q_ref, k_ref, v_ref, o_ref, *, dh, n_real, scale):
    np_rows = q_ref.shape[0]
    col = lax.broadcasted_iota(jnp.int32, (np_rows, np_rows), 1)
    out = _attend_heads(q_ref[...], k_ref[...], v_ref[...],
                        dh=dh, n_real=n_real, scale=scale, col_ids=col)
    o_ref[...] = out.astype(o_ref.dtype)


def pallas_attention(qkv, heads, dim_head, n_real, out_dtype=jnp.bfloat16):
    """Attention reading q/k/v straight from the [Np, 3*inner] QKV buffer."""
    Np, three_inner = qkv.shape
    inner = heads * dim_head
    assert three_inner == 3 * inner
    scale = dim_head ** -0.5

    # pack enough heads per grid step to present 128-wide lane tiles
    hpb = None
    for c in range(1, heads + 1):
        if heads % c == 0 and (c * dim_head) % 128 == 0:
            hpb = c
            break

    if hpb is not None:
        G = heads // hpb
        blk = hpb * dim_head
        kernel = functools.partial(_attn_kernel, dh=dim_head,
                                   n_real=n_real, scale=scale)
        return pl.pallas_call(
            kernel,
            out_shape=jax.ShapeDtypeStruct((Np, inner), out_dtype),
            grid=(G,),
            in_specs=[
                pl.BlockSpec((Np, blk), lambda g: (0, g)),          # q heads
                pl.BlockSpec((Np, blk), lambda g: (0, G + g)),      # k heads
                pl.BlockSpec((Np, blk), lambda g: (0, 2 * G + g)),  # v heads
            ],
            out_specs=pl.BlockSpec((Np, blk), lambda g: (0, g)),
            compiler_params=pltpu.CompilerParams(
                dimension_semantics=("parallel",)),
        )(qkv, qkv, qkv)

    # Fallback for head dims that cannot fill a 128-lane tile: whole QKV in one
    # (always-legal full-extent) block, loop heads inside the kernel.
    def _attn_full_kernel(qkv_ref, o_ref):
        col = lax.broadcasted_iota(jnp.int32, (Np, Np), 1)
        q = qkv_ref[:, :inner]
        k = qkv_ref[:, inner:2 * inner]
        v = qkv_ref[:, 2 * inner:]
        o_ref[...] = _attend_heads(q, k, v, dh=dim_head, n_real=n_real,
                                   scale=scale, col_ids=col).astype(o_ref.dtype)

    return pl.pallas_call(
        _attn_full_kernel,
        out_shape=jax.ShapeDtypeStruct((Np, inner), out_dtype),
        in_specs=[pl.BlockSpec((Np, 3 * inner), lambda: (0, 0))],
        out_specs=pl.BlockSpec((Np, inner), lambda: (0, 0)),
    )(qkv)


def _merge_ln_kernel(x1_ref, x2_ref, g_ref, b_ref, o_ref, *, eps):
    # fused: LN( 0.5 * (x1 + x2) )  -- reversible-stream merge + final LayerNorm
    x = 0.5 * (x1_ref[...].astype(jnp.float32) + x2_ref[...].astype(jnp.float32))
    mu = jnp.mean(x, axis=-1, keepdims=True)
    xc = x - mu
    var = jnp.mean(xc * xc, axis=-1, keepdims=True)
    y = xc * lax.rsqrt(var + eps) * g_ref[...] + b_ref[...]
    o_ref[...] = y.astype(o_ref.dtype)


def pallas_merge_layernorm(x1, x2, g, b, eps=1e-5, out_dtype=jnp.float32):
    M, D = x1.shape
    tm = _pick_tile(M, 256, 8)
    kernel = functools.partial(_merge_ln_kernel, eps=eps)
    return pl.pallas_call(
        kernel,
        out_shape=jax.ShapeDtypeStruct((M, D), out_dtype),
        grid=(M // tm,),
        in_specs=[
            pl.BlockSpec((tm, D), lambda i: (i, 0)),
            pl.BlockSpec((tm, D), lambda i: (i, 0)),
            pl.BlockSpec((1, D), lambda i: (0, 0)),
            pl.BlockSpec((1, D), lambda i: (0, 0)),
        ],
        out_specs=pl.BlockSpec((tm, D), lambda i: (i, 0)),
        compiler_params=pltpu.CompilerParams(dimension_semantics=("parallel",)),
    )(x1, x2, g.reshape(1, D).astype(jnp.float32),
      b.reshape(1, D).astype(jnp.float32))


# --------------------------------------------------------------------------
# Tokenizer (mimics clasp.basic_aa_tokenizer: 23-token amino-acid vocab)
# --------------------------------------------------------------------------
AA_VOCAB = "ACDEFGHIKLMNPQRSTVWYXBZ"  # 23 tokens
_AA_LUT = {c: i for i, c in enumerate(AA_VOCAB)}


def basic_aa_tokenizer(aa_seq: str):
    # TODO(synk): exact index assignment of the real basic_aa_tokenizer vocab
    # differs; this is a deterministic stand-in with the same vocab size (23).
    return jnp.asarray([_AA_LUT[c] for c in aa_seq.upper()], dtype=jnp.int32)


# --------------------------------------------------------------------------
# Deterministic synthetic parameters (structure of clasp Transformer)
# --------------------------------------------------------------------------
def init_params(key, *, num_tokens, dim, depth, seq_len, heads, dim_head, ff_mult):
    inner = heads * dim_head
    keys = jax.random.split(key, 4 + depth)
    params = {
        "token_emb": jax.random.normal(keys[0], (num_tokens, dim), jnp.float32) * 0.02,
        "pos_emb": jax.random.normal(keys[1], (seq_len, dim), jnp.float32) * 0.02,
        "cls_token": jax.random.normal(keys[2], (dim,), jnp.float32) * 0.02,
        "final_ln_g": jnp.ones((dim,), jnp.float32),
        "final_ln_b": jnp.zeros((dim,), jnp.float32),
        "layers": [],
    }
    for l in range(depth):
        lk = jax.random.split(keys[4 + l], 4)
        # matmul weights cast to bf16 once; LN / bias params stay f32
        params["layers"].append({
            "ln_attn_g": jnp.ones((dim,), jnp.float32),
            "ln_attn_b": jnp.zeros((dim,), jnp.float32),
            "w_qkv": (jax.random.normal(lk[0], (dim, 3 * inner), jnp.float32)
                      * dim ** -0.5).astype(jnp.bfloat16),
            "w_out": (jax.random.normal(lk[1], (inner, dim), jnp.float32)
                      * inner ** -0.5).astype(jnp.bfloat16),
            "b_out": jnp.zeros((dim,), jnp.float32),
            "ln_ff_g": jnp.ones((dim,), jnp.float32),
            "ln_ff_b": jnp.zeros((dim,), jnp.float32),
            "w_ff1": (jax.random.normal(lk[2], (dim, ff_mult * dim), jnp.float32)
                      * dim ** -0.5).astype(jnp.bfloat16),
            "b_ff1": jnp.zeros((ff_mult * dim,), jnp.float32),
            "w_ff2": (jax.random.normal(lk[3], (ff_mult * dim, dim), jnp.float32)
                      * (ff_mult * dim) ** -0.5).astype(jnp.bfloat16),
            "b_ff2": jnp.zeros((dim,), jnp.float32),
        })
    return params


# --------------------------------------------------------------------------
# ClaspEmbedder.forward equivalent
# --------------------------------------------------------------------------
@functools.partial(jax.jit, static_argnames=("heads", "dim_head"))
def clasp_embedder_forward(params, tokens, *, heads, dim_head):
    dim = params["token_emb"].shape[1]
    n = int(tokens.shape[0])
    N = n + 1                       # CLS + sequence
    Np = _round_up(N, 8)            # sublane-aligned padded row count

    # token + positional embeddings (gather = glue), prepend CLS token, pad rows
    x = params["token_emb"][tokens] + params["pos_emb"][:n]
    x = jnp.concatenate([params["cls_token"][None, :], x], axis=0)   # [N, dim]
    x = jnp.pad(x, ((0, Np - N), (0, 0))).astype(jnp.float32)        # [Np, dim]

    # reversible=True: two residual streams (ReversibleSequence semantics:
    # duplicate input, y1 = x1 + attn(ln(x2)), y2 = x2 + ff(ln(y1)), mean streams)
    x1 = x
    x2 = x
    for layer in params["layers"]:
        # --- attention block (3 fused pallas_calls) ---
        qkv = pallas_ln_matmul(x2, layer["ln_attn_g"], layer["ln_attn_b"],
                               layer["w_qkv"])                        # [Np, 3*inner]
        o = pallas_attention(qkv, heads, dim_head, N)                 # [Np, inner]
        x1 = pallas_matmul_bias_residual(o, layer["w_out"], layer["b_out"], x1)

        # --- feed-forward block (2 fused pallas_calls) ---
        h = pallas_ln_matmul(x1, layer["ln_ff_g"], layer["ln_ff_b"],
                             layer["w_ff1"], bias=layer["b_ff1"],
                             activation="gelu")                       # [Np, ff]
        x2 = pallas_matmul_bias_residual(h, layer["w_ff2"], layer["b_ff2"], x2)

    out = pallas_merge_layernorm(x1, x2, params["final_ln_g"], params["final_ln_b"])

    # return_all_embeddings=True, drop the CLS token and the row padding
    return out[None, 1:N, :]                                          # [1, n, dim]


# --------------------------------------------------------------------------
# Demo
# --------------------------------------------------------------------------
if __name__ == "__main__":
    key = jax.random.PRNGKey(0)

    # Small config mirroring ClaspTransformer(num_tokens=23, dim=768, depth=12,
    # seq_len=512, heads=8, dim_head=64) at toy sizes (dim_head kept at the
    # real value so the lane-aligned attention path is exercised).
    num_tokens, dim, depth, seq_len = 23, 128, 2, 16
    heads, dim_head, ff_mult = 2, 64, 4

    pkey, _ = jax.random.split(key)
    params = init_params(pkey, num_tokens=num_tokens, dim=dim, depth=depth,
                         seq_len=seq_len, heads=heads, dim_head=dim_head,
                         ff_mult=ff_mult)

    aa_seq = "ACDEFGHK"                       # length-8 amino-acid sequence
    tokens = basic_aa_tokenizer(aa_seq)       # context_length = len(aa_seq)

    out = clasp_embedder_forward(params, tokens, heads=heads, dim_head=dim_head)
    out = jax.block_until_ready(out)

    assert out.shape == (1, len(aa_seq), dim), out.shape
    assert out.dtype == jnp.float32
    assert bool(jnp.all(jnp.isfinite(out)))
    print("KERNEL_OK")
</pallas_src>

<mosaic_0001>
module attributes {stable_mosaic.version = 11 : i64} {
  func.func @_matmul_bias_residual_kernel(%arg0: i32, %arg1: i32, %arg2: memref<16x128xbf16, #tpu.memory_space<vmem>>, %arg3: memref<128x128xbf16, #tpu.memory_space<vmem>>, %arg4: memref<1x128xf32, #tpu.memory_space<vmem>>, %arg5: memref<16x128xf32, #tpu.memory_space<vmem>>, %arg6: memref<16x128xf32, #tpu.memory_space<vmem>>) attributes {dimension_semantics = [#tpu.dimension_semantics<parallel>, #tpu.dimension_semantics<parallel>], iteration_bounds = array<i64: 1, 1>, scalar_prefetch = 0 : i64, scratch_operands = 0 : i64, tpu.core_type = #tpu.core_type<tc>, window_params = [{transform_indices = @transform_0, window_bounds = array<i64: 16, 128>}, {transform_indices = @transform_1, window_bounds = array<i64: 128, 128>}, {transform_indices = @transform_2, window_bounds = array<i64: 1, 128>}, {transform_indices = @transform_3, window_bounds = array<i64: 16, 128>}, {transform_indices = @transform_4, window_bounds = array<i64: 16, 128>}]} {
    %c0 = arith.constant 0 : index
    %c0_0 = arith.constant 0 : index
    %0 = vector.load %arg2[%c0, %c0_0] : memref<16x128xbf16, #tpu.memory_space<vmem>>, vector<16x128xbf16>
    %c0_1 = arith.constant 0 : index
    %c0_2 = arith.constant 0 : index
    %1 = vector.load %arg3[%c0_1, %c0_2] : memref<128x128xbf16, #tpu.memory_space<vmem>>, vector<128x128xbf16>
    %cst = arith.constant dense<0.000000e+00> : vector<16x128xf32>
    %2 = tpu.matmul %0, %1, %cst {dimension_numbers = #tpu.dot_dimension_numbers<[1], [0], [0], [1], [0, 0, 1, 1], [], []>} : vector<16x128xbf16>, vector<128x128xbf16>, vector<16x128xf32> -> vector<16x128xf32>
    %c0_3 = arith.constant 0 : index
    %c0_4 = arith.constant 0 : index
    %3 = vector.load %arg4[%c0_3, %c0_4] : memref<1x128xf32, #tpu.memory_space<vmem>>, vector<1x128xf32>
    %4 = vector.broadcast %3 : vector<1x128xf32> to vector<16x128xf32>
    %5 = arith.addf %2, %4 : vector<16x128xf32>
    %c0_5 = arith.constant 0 : index
    %c0_6 = arith.constant 0 : index
    %6 = vector.load %arg5[%c0_5, %c0_6] : memref<16x128xf32, #tpu.memory_space<vmem>>, vector<16x128xf32>
    %7 = arith.addf %6, %5 : vector<16x128xf32>
    %c0_7 = arith.constant 0 : index
    %c0_8 = arith.constant 0 : index
    %8 = vector.load %arg6[%c0_7, %c0_8] : memref<16x128xf32, #tpu.memory_space<vmem>>, vector<16x128xf32>
    tpu.vector_store %arg6[%c0_7, %c0_8], %7 {strides = array<i32>} : memref<16x128xf32, #tpu.memory_space<vmem>>, vector<16x128xf32>,
    return
  }
  func.func @transform_0(%arg0: i32, %arg1: i32) -> (i32, i32) {
    %c0_i32 = arith.constant 0 : i32
    %c0_i32_0 = arith.constant 0 : i32
    return %arg0, %c0_i32 : i32, i32
  }
  func.func @transform_1(%arg0: i32, %arg1: i32) -> (i32, i32) {
    %c0_i32 = arith.constant 0 : i32
    %c0_i32_0 = arith.constant 0 : i32
    return %c0_i32, %arg1 : i32, i32
  }
  func.func @transform_2(%arg0: i32, %arg1: i32) -> (i32, i32) {
    %c0_i32 = arith.constant 0 : i32
    %c0_i32_0 = arith.constant 0 : i32
    return %c0_i32, %arg1 : i32, i32
  }
  func.func @transform_3(%arg0: i32, %arg1: i32) -> (i32, i32) {
    %c0_i32 = arith.constant 0 : i32
    return %arg0, %arg1 : i32, i32
  }
  func.func @transform_4(%arg0: i32, %arg1: i32) -> (i32, i32) {
    %c0_i32 = arith.constant 0 : i32
    return %arg0, %arg1 : i32, i32
  }
}

module attributes {stable_mosaic.version = 11 : i64} {
  func.func @_attn_kernel(%arg0: i32, %arg1: memref<16x128xbf16, #tpu.memory_space<vmem>>, %arg2: memref<16x128xbf16, #tpu.memory_space<vmem>>, %arg3: memref<16x128xbf16, #tpu.memory_space<vmem>>, %arg4: memref<16x128xbf16, #tpu.memory_space<vmem>>) attributes {dimension_semantics = [#tpu.dimension_semantics<parallel>], iteration_bounds = array<i64: 1>, scalar_prefetch = 0 : i64, scratch_operands = 0 : i64, tpu.core_type = #tpu.core_type<tc>, window_params = [{transform_indices = @transform_0, window_bounds = array<i64: 16, 128>}, {transform_indices = @transform_1, window_bounds = array<i64: 16, 128>}, {transform_indices = @transform_2, window_bounds = array<i64: 16, 128>}, {transform_indices = @transform_3, window_bounds = array<i64: 16, 128>}]} {
    %0 = tpu.iota {dimensions = array<i32: 1>} : vector<16x16xi32>
    %c0 = arith.constant 0 : index
    %c0_0 = arith.constant 0 : index
    %1 = vector.load %arg1[%c0, %c0_0] : memref<16x128xbf16, #tpu.memory_space<vmem>>, vector<16x128xbf16>
    %c0_1 = arith.constant 0 : index
    %c0_2 = arith.constant 0 : index
    %2 = vector.load %arg2[%c0_1, %c0_2] : memref<16x128xbf16, #tpu.memory_space<vmem>>, vector<16x128xbf16>
    %c0_3 = arith.constant 0 : index
    %c0_4 = arith.constant 0 : index
    %3 = vector.load %arg3[%c0_3, %c0_4] : memref<16x128xbf16, #tpu.memory_space<vmem>>, vector<16x128xbf16>
    %4 = vector.extract_strided_slice %1 {offsets = [0, 0], sizes = [16, 64], strides = [1, 1]} : vector<16x128xbf16> to vector<16x64xbf16>
    %5 = arith.extf %4 : vector<16x64xbf16> to vector<16x64xf32>
    %cst = arith.constant 1.250000e-01 : f32
    %6 = vector.broadcast %cst : f32 to vector<16x64xf32>
    %7 = arith.mulf %5, %6 : vector<16x64xf32>
    %8 = arith.truncf %7 : vector<16x64xf32> to vector<16x64xbf16>
    %9 = vector.extract_strided_slice %2 {offsets = [0, 0], sizes = [16, 64], strides = [1, 1]} : vector<16x128xbf16> to vector<16x64xbf16>
    %10 = tpu.transpose %9, [1, 0] : vector<16x64xbf16> -> vector<64x16xbf16>
    %cst_5 = arith.constant dense<0.000000e+00> : vector<16x16xf32>
    %11 = tpu.matmul %8, %10, %cst_5 {dimension_numbers = #tpu.dot_dimension_numbers<[1], [0], [0], [1], [0, 0, 1, 1], [], []>} : vector<16x64xbf16>, vector<64x16xbf16>, vector<16x16xf32> -> vector<16x16xf32>
    %c9_i32 = arith.constant 9 : i32
    %12 = vector.broadcast %c9_i32 : i32 to vector<16x16xi32>
    %13 = arith.cmpi slt, %0, %12 : vector<16x16xi32>
    %cst_6 = arith.constant -1.000000e+30 : f32
    %14 = vector.broadcast %cst_6 : f32 to vector<16x16xf32>
    %15 = arith.select %13, %11, %14 : vector<16x16xi1>, vector<16x16xf32>
    %cst_7 = arith.constant dense<0xFF800000> : vector<16xf32>
    %16 = vector.multi_reduction <maximumf>, %15, %cst_7 [1] : vector<16x16xf32> to vector<16xf32>
    %17 = vector.shape_cast %16 : vector<16xf32> to vector<16x1xf32>
    %18 = vector.broadcast %17 : vector<16x1xf32> to vector<16x16xf32>
    %19 = arith.subf %15, %18 : vector<16x16xf32>
    %20 = math.exp %19 : vector<16x16xf32>
    %cst_8 = arith.constant dense<0.000000e+00> : vector<16xf32>
    %21 = vector.multi_reduction <add>, %20, %cst_8 [1] : vector<16x16xf32> to vector<16xf32>
    %22 = vector.shape_cast %21 : vector<16xf32> to vector<16x1xf32>
    %23 = tpu.reciprocal %22 {approx = true} : vector<16x1xf32> -> vector<16x1xf32>
    %24 = vector.broadcast %23 : vector<16x1xf32> to vector<16x16xf32>
    %25 = arith.mulf %20, %24 : vector<16x16xf32>
    %26 = arith.truncf %25 : vector<16x16xf32> to vector<16x16xbf16>
    %27 = vector.extract_strided_slice %3 {offsets = [0, 0], sizes = [16, 64], strides = [1, 1]} : vector<16x128xbf16> to vector<16x64xbf16>
    %cst_9 = arith.constant dense<0.000000e+00> : vector<16x64xf32>
    %28 = tpu.matmul %26, %27, %cst_9 {dimension_numbers = #tpu.dot_dimension_numbers<[1], [0], [0], [1], [0, 0, 1, 1], [], []>} : vector<16x16xbf16>, vector<16x64xbf16>, vector<16x64xf32> -> vector<16x64xf32>
    %29 = vector.extract_strided_slice %1 {offsets = [0, 64], sizes = [16, 64], strides = [1, 1]} : vector<16x128xbf16> to vector<16x64xbf16>
    %30 = arith.extf %29 : vector<16x64xbf16> to vector<16x64xf32>
    %cst_10 = arith.constant 1.250000e-01 : f32
    %31 = vector.broadcast %cst_10 : f32 to vector<16x64xf32>
    %32 = arith.mulf %30, %31 : vector<16x64xf32>
    %33 = arith.truncf %32 : vector<16x64xf32> to vector<16x64xbf16>
    %34 = vector.extract_strided_slice %2 {offsets = [0, 64], sizes = [16, 64], strides = [1, 1]} : vector<16x128xbf16> to vector<16x64xbf16>
    %35 = tpu.transpose %34, [1, 0] : vector<16x64xbf16> -> vector<64x16xbf16>
    %cst_11 = arith.constant dense<0.000000e+00> : vector<16x16xf32>
    %36 = tpu.matmul %33, %35, %cst_11 {dimension_numbers = #tpu.dot_dimension_numbers<[1], [0], [0], [1], [0, 0, 1, 1], [], []>} : vector<16x64xbf16>, vector<64x16xbf16>, vector<16x16xf32> -> vector<16x16xf32>
    %c9_i32_12 = arith.constant 9 : i32
    %37 = vector.broadcast %c9_i32_12 : i32 to vector<16x16xi32>
    %38 = arith.cmpi slt, %0, %37 : vector<16x16xi32>
    %cst_13 = arith.constant -1.000000e+30 : f32
    %39 = vector.broadcast %cst_13 : f32 to vector<16x16xf32>
    %40 = arith.select %38, %36, %39 : vector<16x16xi1>, vector<16x16xf32>
    %cst_14 = arith.constant dense<0xFF800000> : vector<16xf32>
    %41 = vector.multi_reduction <maximumf>, %40, %cst_14 [1] : vector<16x16xf32> to vector<16xf32>
    %42 = vector.shape_cast %41 : vector<16xf32> to vector<16x1xf32>
    %43 = vector.broadcast %42 : vector<16x1xf32> to vector<16x16xf32>
    %44 = arith.subf %40, %43 : vector<16x16xf32>
    %45 = math.exp %44 : vector<16x16xf32>
    %cst_15 = arith.constant dense<0.000000e+00> : vector<16xf32>
    %46 = vector.multi_reduction <add>, %45, %cst_15 [1] : vector<16x16xf32> to vector<16xf32>
    %47 = vector.shape_cast %46 : vector<16xf32> to vector<16x1xf32>
    %48 = tpu.reciprocal %47 {approx = true} : vector<16x1xf32> -> vector<16x1xf32>
    %49 = vector.broadcast %48 : vector<16x1xf32> to vector<16x16xf32>
    %50 = arith.mulf %45, %49 : vector<16x16xf32>
    %51 = arith.truncf %50 : vector<16x16xf32> to vector<16x16xbf16>
    %52 = vector.extract_strided_slice %3 {offsets = [0, 64], sizes = [16, 64], strides = [1, 1]} : vector<16x128xbf16> to vector<16x64xbf16>
    %cst_16 = arith.constant dense<0.000000e+00> : vector<16x64xf32>
    %53 = tpu.matmul %51, %52, %cst_16 {dimension_numbers = #tpu.dot_dimension_numbers<[1], [0], [0], [1], [0, 0, 1, 1], [], []>} : vector<16x16xbf16>, vector<16x64xbf16>, vector<16x64xf32> -> vector<16x64xf32>
    %54 = tpu.concatenate %28, %53 in 1 : vector<16x64xf32>, vector<16x64xf32> -> vector<16x128xf32>
    %55 = arith.truncf %54 : vector<16x128xf32> to vector<16x128xbf16>
    %c0_17 = arith.constant 0 : index
    %c0_18 = arith.constant 0 : index
    %56 = vector.load %arg4[%c0_17, %c0_18] : memref<16x128xbf16, #tpu.memory_space<vmem>>, vector<16x128xbf16>
    tpu.vector_store %arg4[%c0_17, %c0_18], %55 {strides = array<i32>} : memref<16x128xbf16, #tpu.memory_space<vmem>>, vector<16x128xbf16>,
    return
  }
  func.func @transform_0(%arg0: i32) -> (i32, i32) {
    %c0_i32 = arith.constant 0 : i32
    %c0_i32_0 = arith.constant 0 : i32
    return %c0_i32, %arg0 : i32, i32
  }
  func.func @transform_1(%arg0: i32) -> (i32, i32) {
    %c1_i32 = arith.constant 1 : i32
    %0 = arith.addi %c1_i32, %arg0 : i32
    %c0_i32 = arith.constant 0 : i32
    %c0_i32_0 = arith.constant 0 : i32
    return %c0_i32, %0 : i32, i32
  }
  func.func @transform_2(%arg0: i32) -> (i32, i32) {
    %c2_i32 = arith.constant 2 : i32
    %0 = arith.addi %c2_i32, %arg0 : i32
    %c0_i32 = arith.constant 0 : i32
    %c0_i32_0 = arith.constant 0 : i32
    return %c0_i32, %0 : i32, i32
  }
  func.func @transform_3(%arg0: i32) -> (i32, i32) {
    %c0_i32 = arith.constant 0 : i32
    %c0_i32_0 = arith.constant 0 : i32
    return %c0_i32, %arg0 : i32, i32
  }
}

module attributes {stable_mosaic.version = 11 : i64} {
  func.func @_ln_matmul_kernel(%arg0: i32, %arg1: i32, %arg2: memref<16x128xf32, #tpu.memory_space<vmem>>, %arg3: memref<1x128xf32, #tpu.memory_space<vmem>>, %arg4: memref<1x128xf32, #tpu.memory_space<vmem>>, %arg5: memref<128x384xbf16, #tpu.memory_space<vmem>>, %arg6: memref<16x384xbf16, #tpu.memory_space<vmem>>) attributes {dimension_semantics = [#tpu.dimension_semantics<parallel>, #tpu.dimension_semantics<parallel>], iteration_bounds = array<i64: 1, 1>, scalar_prefetch = 0 : i64, scratch_operands = 0 : i64, tpu.core_type = #tpu.core_type<tc>, window_params = [{transform_indices = @transform_0, window_bounds = array<i64: 16, 128>}, {pipeline_mode = #tpu.pipeline_mode<synchronous>, transform_indices = @transform_1, window_bounds = array<i64: 1, 128>}, {pipeline_mode = #tpu.pipeline_mode<synchronous>, transform_indices = @transform_2, window_bounds = array<i64: 1, 128>}, {transform_indices = @transform_3, window_bounds = array<i64: 128, 384>}, {transform_indices = @transform_4, window_bounds = array<i64: 16, 384>}]} {
    %c0 = arith.constant 0 : index
    %c0_0 = arith.constant 0 : index
    %0 = vector.load %arg2[%c0, %c0_0] : memref<16x128xf32, #tpu.memory_space<vmem>>, vector<16x128xf32>
    %cst = arith.constant dense<0.000000e+00> : vector<16xf32>
    %1 = vector.multi_reduction <add>, %0, %cst [1] : vector<16x128xf32> to vector<16xf32>
    %2 = vector.shape_cast %1 : vector<16xf32> to vector<16x1xf32>
    %cst_1 = arith.constant 1.280000e+02 : f32
    %3 = vector.broadcast %cst_1 : f32 to vector<16x1xf32>
    %4 = arith.divf %2, %3 : vector<16x1xf32>
    %5 = vector.broadcast %4 : vector<16x1xf32> to vector<16x128xf32>
    %6 = arith.subf %0, %5 : vector<16x128xf32>
    %7 = arith.mulf %6, %6 : vector<16x128xf32>
    %cst_2 = arith.constant dense<0.000000e+00> : vector<16xf32>
    %8 = vector.multi_reduction <add>, %7, %cst_2 [1] : vector<16x128xf32> to vector<16xf32>
    %9 = vector.shape_cast %8 : vector<16xf32> to vector<16x1xf32>
    %cst_3 = arith.constant 1.280000e+02 : f32
    %10 = vector.broadcast %cst_3 : f32 to vector<16x1xf32>
    %11 = arith.divf %9, %10 : vector<16x1xf32>
    %cst_4 = arith.constant 9.99999974E-6 : f32
    %12 = vector.broadcast %cst_4 : f32 to vector<16x1xf32>
    %13 = arith.addf %11, %12 : vector<16x1xf32>
    %14 = math.rsqrt %13 : vector<16x1xf32>
    %15 = vector.broadcast %14 : vector<16x1xf32> to vector<16x128xf32>
    %16 = arith.mulf %6, %15 : vector<16x128xf32>
    %c0_5 = arith.constant 0 : index
    %c0_6 = arith.constant 0 : index
    %17 = vector.load %arg3[%c0_5, %c0_6] : memref<1x128xf32, #tpu.memory_space<vmem>>, vector<1x128xf32>
    %18 = vector.broadcast %17 : vector<1x128xf32> to vector<16x128xf32>
    %19 = arith.mulf %16, %18 : vector<16x128xf32>
    %c0_7 = arith.constant 0 : index
    %c0_8 = arith.constant 0 : index
    %20 = vector.load %arg4[%c0_7, %c0_8] : memref<1x128xf32, #tpu.memory_space<vmem>>, vector<1x128xf32>
    %21 = vector.broadcast %20 : vector<1x128xf32> to vector<16x128xf32>
    %22 = arith.addf %19, %21 : vector<16x128xf32>
    %23 = arith.truncf %22 : vector<16x128xf32> to vector<16x128xbf16>
    %c0_9 = arith.constant 0 : index
    %c0_10 = arith.constant 0 : index
    %24 = vector.load %arg5[%c0_9, %c0_10] : memref<128x384xbf16, #tpu.memory_space<vmem>>, vector<128x384xbf16>
    %cst_11 = arith.constant dense<0.000000e+00> : vector<16x384xf32>
    %25 = tpu.matmul %23, %24, %cst_11 {dimension_numbers = #tpu.dot_dimension_numbers<[1], [0], [0], [1], [0, 0, 1, 1], [], []>} : vector<16x128xbf16>, vector<128x384xbf16>, vector<16x384xf32> -> vector<16x384xf32>
    %26 = arith.truncf %25 : vector<16x384xf32> to vector<16x384xbf16>
    %c0_12 = arith.constant 0 : index
    %c0_13 = arith.constant 0 : index
    %27 = vector.load %arg6[%c0_12, %c0_13] : memref<16x384xbf16, #tpu.memory_space<vmem>>, vector<16x384xbf16>
    tpu.vector_store %arg6[%c0_12, %c0_13], %26 {strides = array<i32>} : memref<16x384xbf16, #tpu.memory_space<vmem>>, vector<16x384xbf16>,
    return
  }
  func.func @transform_0(%arg0: i32, %arg1: i32) -> (i32, i32) {
    %c0_i32 = arith.constant 0 : i32
    %c0_i32_0 = arith.constant 0 : i32
    return %arg0, %c0_i32 : i32, i32
  }
  func.func @transform_1(%arg0: i32, %arg1: i32) -> (i32, i32) {
    %c0_i32 = arith.constant 0 : i32
    %c0_i32_0 = arith.constant 0 : i32
    %c0_i32_1 = arith.constant 0 : i32
    return %c0_i32, %c0_i32_0 : i32, i32
  }
  func.func @transform_2(%arg0: i32, %arg1: i32) -> (i32, i32) {
    %c0_i32 = arith.constant 0 : i32
    %c0_i32_0 = arith.constant 0 : i32
    %c0_i32_1 = arith.constant 0 : i32
    return %c0_i32, %c0_i32_0 : i32, i32
  }
  func.func @transform_3(%arg0: i32, %arg1: i32) -> (i32, i32) {
    %c0_i32 = arith.constant 0 : i32
    %c0_i32_0 = arith.constant 0 : i32
    return %c0_i32, %arg1 : i32, i32
  }
  func.func @transform_4(%arg0: i32, %arg1: i32) -> (i32, i32) {
    %c0_i32 = arith.constant 0 : i32
    return %arg0, %arg1 : i32, i32
  }
}

module attributes {stable_mosaic.version = 11 : i64} {
  func.func @_ln_matmul_kernel(%arg0: i32, %arg1: i32, %arg2: memref<16x128xf32, #tpu.memory_space<vmem>>, %arg3: memref<1x128xf32, #tpu.memory_space<vmem>>, %arg4: memref<1x128xf32, #tpu.memory_space<vmem>>, %arg5: memref<128x512xbf16, #tpu.memory_space<vmem>>, %arg6: memref<1x512xf32, #tpu.memory_space<vmem>>, %arg7: memref<16x512xbf16, #tpu.memory_space<vmem>>) attributes {dimension_semantics = [#tpu.dimension_semantics<parallel>, #tpu.dimension_semantics<parallel>], iteration_bounds = array<i64: 1, 1>, scalar_prefetch = 0 : i64, scratch_operands = 0 : i64, tpu.core_type = #tpu.core_type<tc>, window_params = [{transform_indices = @transform_0, window_bounds = array<i64: 16, 128>}, {pipeline_mode = #tpu.pipeline_mode<synchronous>, transform_indices = @transform_1, window_bounds = array<i64: 1, 128>}, {pipeline_mode = #tpu.pipeline_mode<synchronous>, transform_indices = @transform_2, window_bounds = array<i64: 1, 128>}, {transform_indices = @transform_3, window_bounds = array<i64: 128, 512>}, {transform_indices = @transform_4, window_bounds = array<i64: 1, 512>}, {transform_indices = @transform_5, window_bounds = array<i64: 16, 512>}]} {
    %c0 = arith.constant 0 : index
    %c0_0 = arith.constant 0 : index
    %0 = vector.load %arg2[%c0, %c0_0] : memref<16x128xf32, #tpu.memory_space<vmem>>, vector<16x128xf32>
    %cst = arith.constant dense<0.000000e+00> : vector<16xf32>
    %1 = vector.multi_reduction <add>, %0, %cst [1] : vector<16x128xf32> to vector<16xf32>
    %2 = vector.shape_cast %1 : vector<16xf32> to vector<16x1xf32>
    %cst_1 = arith.constant 1.280000e+02 : f32
    %3 = vector.broadcast %cst_1 : f32 to vector<16x1xf32>
    %4 = arith.divf %2, %3 : vector<16x1xf32>
    %5 = vector.broadcast %4 : vector<16x1xf32> to vector<16x128xf32>
    %6 = arith.subf %0, %5 : vector<16x128xf32>
    %7 = arith.mulf %6, %6 : vector<16x128xf32>
    %cst_2 = arith.constant dense<0.000000e+00> : vector<16xf32>
    %8 = vector.multi_reduction <add>, %7, %cst_2 [1] : vector<16x128xf32> to vector<16xf32>
    %9 = vector.shape_cast %8 : vector<16xf32> to vector<16x1xf32>
    %cst_3 = arith.constant 1.280000e+02 : f32
    %10 = vector.broadcast %cst_3 : f32 to vector<16x1xf32>
    %11 = arith.divf %9, %10 : vector<16x1xf32>
    %cst_4 = arith.constant 9.99999974E-6 : f32
    %12 = vector.broadcast %cst_4 : f32 to vector<16x1xf32>
    %13 = arith.addf %11, %12 : vector<16x1xf32>
    %14 = math.rsqrt %13 : vector<16x1xf32>
    %15 = vector.broadcast %14 : vector<16x1xf32> to vector<16x128xf32>
    %16 = arith.mulf %6, %15 : vector<16x128xf32>
    %c0_5 = arith.constant 0 : index
    %c0_6 = arith.constant 0 : index
    %17 = vector.load %arg3[%c0_5, %c0_6] : memref<1x128xf32, #tpu.memory_space<vmem>>, vector<1x128xf32>
    %18 = vector.broadcast %17 : vector<1x128xf32> to vector<16x128xf32>
    %19 = arith.mulf %16, %18 : vector<16x128xf32>
    %c0_7 = arith.constant 0 : index
    %c0_8 = arith.constant 0 : index
    %20 = vector.load %arg4[%c0_7, %c0_8] : memref<1x128xf32, #tpu.memory_space<vmem>>, vector<1x128xf32>
    %21 = vector.broadcast %20 : vector<1x128xf32> to vector<16x128xf32>
    %22 = arith.addf %19, %21 : vector<16x128xf32>
    %23 = arith.truncf %22 : vector<16x128xf32> to vector<16x128xbf16>
    %c0_9 = arith.constant 0 : index
    %c0_10 = arith.constant 0 : index
    %24 = vector.load %arg5[%c0_9, %c0_10] : memref<128x512xbf16, #tpu.memory_space<vmem>>, vector<128x512xbf16>
    %cst_11 = arith.constant dense<0.000000e+00> : vector<16x512xf32>
    %25 = tpu.matmul %23, %24, %cst_11 {dimension_numbers = #tpu.dot_dimension_numbers<[1], [0], [0], [1], [0, 0, 1, 1], [], []>} : vector<16x128xbf16>, vector<128x512xbf16>, vector<16x512xf32> -> vector<16x512xf32>
    %c0_12 = arith.constant 0 : index
    %c0_13 = arith.constant 0 : index
    %26 = vector.load %arg6[%c0_12, %c0_13] : memref<1x512xf32, #tpu.memory_space<vmem>>, vector<1x512xf32>
    %27 = vector.broadcast %26 : vector<1x512xf32> to vector<16x512xf32>
    %28 = arith.addf %25, %27 : vector<16x512xf32>
    %cst_14 = arith.constant 5.000000e-01 : f32
    %29 = vector.broadcast %cst_14 : f32 to vector<16x512xf32>
    %30 = arith.mulf %29, %28 : vector<16x512xf32>
    %cst_15 = arith.constant 0.707106769 : f32
    %31 = vector.broadcast %cst_15 : f32 to vector<16x512xf32>
    %32 = arith.mulf %28, %31 : vector<16x512xf32>
    %33 = math.erf %32 : vector<16x512xf32>
    %cst_16 = arith.constant 1.000000e+00 : f32
    %34 = vector.broadcast %cst_16 : f32 to vector<16x512xf32>
    %35 = arith.addf %34, %33 : vector<16x512xf32>
    %36 = arith.mulf %30, %35 : vector<16x512xf32>
    %37 = arith.truncf %36 : vector<16x512xf32> to vector<16x512xbf16>
    %c0_17 = arith.constant 0 : index
    %c0_18 = arith.constant 0 : index
    %38 = vector.load %arg7[%c0_17, %c0_18] : memref<16x512xbf16, #tpu.memory_space<vmem>>, vector<16x512xbf16>
    tpu.vector_store %arg7[%c0_17, %c0_18], %37 {strides = array<i32>} : memref<16x512xbf16, #tpu.memory_space<vmem>>, vector<16x512xbf16>,
    return
  }
  func.func @transform_0(%arg0: i32, %arg1: i32) -> (i32, i32) {
    %c0_i32 = arith.constant 0 : i32
    %c0_i32_0 = arith.constant 0 : i32
    return %arg0, %c0_i32 : i32, i32
  }
  func.func @transform_1(%arg0: i32, %arg1: i32) -> (i32, i32) {
    %c0_i32 = arith.constant 0 : i32
    %c0_i32_0 = arith.constant 0 : i32
    %c0_i32_1 = arith.constant 0 : i32
    return %c0_i32, %c0_i32_0 : i32, i32
  }
  func.func @transform_2(%arg0: i32, %arg1: i32) -> (i32, i32) {
    %c0_i32 = arith.constant 0 : i32
    %c0_i32_0 = arith.constant 0 : i32
    %c0_i32_1 = arith.constant 0 : i32
    return %c0_i32, %c0_i32_0 : i32, i32
  }
  func.func @transform_3(%arg0: i32, %arg1: i32) -> (i32, i32) {
    %c0_i32 = arith.constant 0 : i32
    %c0_i32_0 = arith.constant 0 : i32
    return %c0_i32, %arg1 : i32, i32
  }
  func.func @transform_4(%arg0: i32, %arg1: i32) -> (i32, i32) {
    %c0_i32 = arith.constant 0 : i32
    %c0_i32_0 = arith.constant 0 : i32
    return %c0_i32, %arg1 : i32, i32
  }
  func.func @transform_5(%arg0: i32, %arg1: i32) -> (i32, i32) {
    %c0_i32 = arith.constant 0 : i32
    return %arg0, %arg1 : i32, i32
  }
}

module attributes {stable_mosaic.version = 11 : i64} {
  func.func @_matmul_bias_residual_kernel(%arg0: i32, %arg1: i32, %arg2: memref<16x512xbf16, #tpu.memory_space<vmem>>, %arg3: memref<512x128xbf16, #tpu.memory_space<vmem>>, %arg4: memref<1x128xf32, #tpu.memory_space<vmem>>, %arg5: memref<16x128xf32, #tpu.memory_space<vmem>>, %arg6: memref<16x128xf32, #tpu.memory_space<vmem>>) attributes {dimension_semantics = [#tpu.dimension_semantics<parallel>, #tpu.dimension_semantics<parallel>], iteration_bounds = array<i64: 1, 1>, scalar_prefetch = 0 : i64, scratch_operands = 0 : i64, tpu.core_type = #tpu.core_type<tc>, window_params = [{transform_indices = @transform_0, window_bounds = array<i64: 16, 512>}, {transform_indices = @transform_1, window_bounds = array<i64: 512, 128>}, {transform_indices = @transform_2, window_bounds = array<i64: 1, 128>}, {transform_indices = @transform_3, window_bounds = array<i64: 16, 128>}, {transform_indices = @transform_4, window_bounds = array<i64: 16, 128>}]} {
    %c0 = arith.constant 0 : index
    %c0_0 = arith.constant 0 : index
    %0 = vector.load %arg2[%c0, %c0_0] : memref<16x512xbf16, #tpu.memory_space<vmem>>, vector<16x512xbf16>
    %c0_1 = arith.constant 0 : index
    %c0_2 = arith.constant 0 : index
    %1 = vector.load %arg3[%c0_1, %c0_2] : memref<512x128xbf16, #tpu.memory_space<vmem>>, vector<512x128xbf16>
    %cst = arith.constant dense<0.000000e+00> : vector<16x128xf32>
    %2 = tpu.matmul %0, %1, %cst {dimension_numbers = #tpu.dot_dimension_numbers<[1], [0], [0], [1], [0, 0, 1, 1], [], []>} : vector<16x512xbf16>, vector<512x128xbf16>, vector<16x128xf32> -> vector<16x128xf32>
    %c0_3 = arith.constant 0 : index
    %c0_4 = arith.constant 0 : index
    %3 = vector.load %arg4[%c0_3, %c0_4] : memref<1x128xf32, #tpu.memory_space<vmem>>, vector<1x128xf32>
    %4 = vector.broadcast %3 : vector<1x128xf32> to vector<16x128xf32>
    %5 = arith.addf %2, %4 : vector<16x128xf32>
    %c0_5 = arith.constant 0 : index
    %c0_6 = arith.constant 0 : index
    %6 = vector.load %arg5[%c0_5, %c0_6] : memref<16x128xf32, #tpu.memory_space<vmem>>, vector<16x128xf32>
    %7 = arith.addf %6, %5 : vector<16x128xf32>
    %c0_7 = arith.constant 0 : index
    %c0_8 = arith.constant 0 : index
    %8 = vector.load %arg6[%c0_7, %c0_8] : memref<16x128xf32, #tpu.memory_space<vmem>>, vector<16x128xf32>
    tpu.vector_store %arg6[%c0_7, %c0_8], %7 {strides = array<i32>} : memref<16x128xf32, #tpu.memory_space<vmem>>, vector<16x128xf32>,
    return
  }
  func.func @transform_0(%arg0: i32, %arg1: i32) -> (i32, i32) {
    %c0_i32 = arith.constant 0 : i32
    %c0_i32_0 = arith.constant 0 : i32
    return %arg0, %c0_i32 : i32, i32
  }
  func.func @transform_1(%arg0: i32, %arg1: i32) -> (i32, i32) {
    %c0_i32 = arith.constant 0 : i32
    %c0_i32_0 = arith.constant 0 : i32
    return %c0_i32, %arg1 : i32, i32
  }
  func.func @transform_2(%arg0: i32, %arg1: i32) -> (i32, i32) {
    %c0_i32 = arith.constant 0 : i32
    %c0_i32_0 = arith.constant 0 : i32
    return %c0_i32, %arg1 : i32, i32
  }
  func.func @transform_3(%arg0: i32, %arg1: i32) -> (i32, i32) {
    %c0_i32 = arith.constant 0 : i32
    return %arg0, %arg1 : i32, i32
  }
  func.func @transform_4(%arg0: i32, %arg1: i32) -> (i32, i32) {
    %c0_i32 = arith.constant 0 : i32
    return %arg0, %arg1 : i32, i32
  }
}

module attributes {stable_mosaic.version = 11 : i64} {
  func.func @_merge_ln_kernel(%arg0: i32, %arg1: memref<16x128xf32, #tpu.memory_space<vmem>>, %arg2: memref<16x128xf32, #tpu.memory_space<vmem>>, %arg3: memref<1x128xf32, #tpu.memory_space<vmem>>, %arg4: memref<1x128xf32, #tpu.memory_space<vmem>>, %arg5: memref<16x128xf32, #tpu.memory_space<vmem>>) attributes {dimension_semantics = [#tpu.dimension_semantics<parallel>], iteration_bounds = array<i64: 1>, scalar_prefetch = 0 : i64, scratch_operands = 0 : i64, tpu.core_type = #tpu.core_type<tc>, window_params = [{transform_indices = @transform_0, window_bounds = array<i64: 16, 128>}, {transform_indices = @transform_1, window_bounds = array<i64: 16, 128>}, {pipeline_mode = #tpu.pipeline_mode<synchronous>, transform_indices = @transform_2, window_bounds = array<i64: 1, 128>}, {pipeline_mode = #tpu.pipeline_mode<synchronous>, transform_indices = @transform_3, window_bounds = array<i64: 1, 128>}, {transform_indices = @transform_4, window_bounds = array<i64: 16, 128>}]} {
    %c0 = arith.constant 0 : index
    %c0_0 = arith.constant 0 : index
    %0 = vector.load %arg1[%c0, %c0_0] : memref<16x128xf32, #tpu.memory_space<vmem>>, vector<16x128xf32>
    %c0_1 = arith.constant 0 : index
    %c0_2 = arith.constant 0 : index
    %1 = vector.load %arg2[%c0_1, %c0_2] : memref<16x128xf32, #tpu.memory_space<vmem>>, vector<16x128xf32>
    %2 = arith.addf %0, %1 : vector<16x128xf32>
    %cst = arith.constant 5.000000e-01 : f32
    %3 = vector.broadcast %cst : f32 to vector<16x128xf32>
    %4 = arith.mulf %3, %2 : vector<16x128xf32>
    %cst_3 = arith.constant dense<0.000000e+00> : vector<16xf32>
    %5 = vector.multi_reduction <add>, %4, %cst_3 [1] : vector<16x128xf32> to vector<16xf32>
    %6 = vector.shape_cast %5 : vector<16xf32> to vector<16x1xf32>
    %cst_4 = arith.constant 1.280000e+02 : f32
    %7 = vector.broadcast %cst_4 : f32 to vector<16x1xf32>
    %8 = arith.divf %6, %7 : vector<16x1xf32>
    %9 = vector.broadcast %8 : vector<16x1xf32> to vector<16x128xf32>
    %10 = arith.subf %4, %9 : vector<16x128xf32>
    %11 = arith.mulf %10, %10 : vector<16x128xf32>
    %cst_5 = arith.constant dense<0.000000e+00> : vector<16xf32>
    %12 = vector.multi_reduction <add>, %11, %cst_5 [1] : vector<16x128xf32> to vector<16xf32>
    %13 = vector.shape_cast %12 : vector<16xf32> to vector<16x1xf32>
    %cst_6 = arith.constant 1.280000e+02 : f32
    %14 = vector.broadcast %cst_6 : f32 to vector<16x1xf32>
    %15 = arith.divf %13, %14 : vector<16x1xf32>
    %cst_7 = arith.constant 9.99999974E-6 : f32
    %16 = vector.broadcast %cst_7 : f32 to vector<16x1xf32>
    %17 = arith.addf %15, %16 : vector<16x1xf32>
    %18 = math.rsqrt %17 : vector<16x1xf32>
    %19 = vector.broadcast %18 : vector<16x1xf32> to vector<16x128xf32>
    %20 = arith.mulf %10, %19 : vector<16x128xf32>
    %c0_8 = arith.constant 0 : index
    %c0_9 = arith.constant 0 : index
    %21 = vector.load %arg3[%c0_8, %c0_9] : memref<1x128xf32, #tpu.memory_space<vmem>>, vector<1x128xf32>
    %22 = vector.broadcast %21 : vector<1x128xf32> to vector<16x128xf32>
    %23 = arith.mulf %20, %22 : vector<16x128xf32>
    %c0_10 = arith.constant 0 : index
    %c0_11 = arith.constant 0 : index
    %24 = vector.load %arg4[%c0_10, %c0_11] : memref<1x128xf32, #tpu.memory_space<vmem>>, vector<1x128xf32>
    %25 = vector.broadcast %24 : vector<1x128xf32> to vector<16x128xf32>
    %26 = arith.addf %23, %25 : vector<16x128xf32>
    %c0_12 = arith.constant 0 : index
    %c0_13 = arith.constant 0 : index
    %27 = vector.load %arg5[%c0_12, %c0_13] : memref<16x128xf32, #tpu.memory_space<vmem>>, vector<16x128xf32>
    tpu.vector_store %arg5[%c0_12, %c0_13], %26 {strides = array<i32>} : memref<16x128xf32, #tpu.memory_space<vmem>>, vector<16x128xf32>,
    return
  }
  func.func @transform_0(%arg0: i32) -> (i32, i32) {
    %c0_i32 = arith.constant 0 : i32
    %c0_i32_0 = arith.constant 0 : i32
    return %arg0, %c0_i32 : i32, i32
  }
  func.func @transform_1(%arg0: i32) -> (i32, i32) {
    %c0_i32 = arith.constant 0 : i32
    %c0_i32_0 = arith.constant 0 : i32
    return %arg0, %c0_i32 : i32, i32
  }
  func.func @transform_2(%arg0: i32) -> (i32, i32) {
    %c0_i32 = arith.constant 0 : i32
    %c0_i32_0 = arith.constant 0 : i32
    %c0_i32_1 = arith.constant 0 : i32
    return %c0_i32, %c0_i32_0 : i32, i32
  }
  func.func @transform_3(%arg0: i32) -> (i32, i32) {
    %c0_i32 = arith.constant 0 : i32
    %c0_i32_0 = arith.constant 0 : i32
    %c0_i32_1 = arith.constant 0 : i32
    return %c0_i32, %c0_i32_0 : i32, i32
  }
  func.func @transform_4(%arg0: i32) -> (i32, i32) {
    %c0_i32 = arith.constant 0 : i32
    %c0_i32_0 = arith.constant 0 : i32
    return %arg0, %c0_i32 : i32, i32
  }
}

</mosaic_0001>

<bundles_post_ra>
// kernel: clasp_embedder_forward.12
= control target key start
LH: loop header
LB: loop body
LE: loop exit
PB: predicated region body
PF: predicated region fallthrough
CT: control target
= control target key end

     0   :  { %v544_v2 = vmov 0.0   ;;  %vm545_vm0 = vmmov 0   ;;  %vm176_vm1 = vcmask 523264   ;;  %v158_v13 = vlaneseq  ;;  %s631_s0 = inlined_call_operand.vmem [shape: bf16[16,384], index: 0, kind: input, shape index: {}, may-alias: {0,1,2}]   ;;  %s632_s1 = inlined_call_operand.vmem [shape: bf16[16,384], index: 1, kind: input, shape index: {}, may-alias: {0,1,2}]   ;;  %s633_s2 = inlined_call_operand.vmem [shape: bf16[16,384], index: 2, kind: input, shape index: {}, may-alias: {0,1,2}]   ;;  %s634_s3 = inlined_call_operand.vmem [shape: bf16[16,128], index: 3, kind: output, shape index: {}]  }
   0x1   :  { %v463_v0 = vld [vmem:[%s632_s1 + $0x4] sm:$0xf]  ;;  %v464_v1 = vld [vmem:[%s632_s1 + $0x10] sm:$0xf]  ;;  %494 = vmatprep.subr.bf16.mxu0 %v544_v2  ;;  %v25_v3 = vld [vmem:[%s631_s0] sm:$0xf]  ;;  %500 = vmatprep.subr.bf16.mxu1 %v544_v2 }
   0x2   :  { %74 = vst [vmem:[#allocation3] sm:$0xf] %v463_v0  ;;  %76 = vst [vmem:[#allocation3 + $0x4] sm:$0xf] %v464_v1  ;;  %v27_v4 = vld [vmem:[%s631_s0 + $0xc] sm:$0xf]  ;;  %496 = vmatprep.mubr.msk.bf16.mxu0 %vm545_vm0, %v544_v2  ;;  %502 = vmatprep.mubr.msk.bf16.mxu1 %vm545_vm0, %v544_v2 }
   0x3   :  { %26 = vst [vmem:[#allocation2] sm:$0xf] %v25_v3  ;;  %28 = vst [vmem:[#allocation2 + $0x4] sm:$0xf] %v27_v4  ;;  %v590_v14 = vand.u32 127, %v158_v13  ;;  %vm227_vm3 = vcmask 130048  }
   0x4   :  { %s546_s0 = smov 64   ;;  %v465_v33 = vld [vmem:[%s633_s2 + $0x8] sm:$0xf]  ;;  %v466_v34 = vld [vmem:[%s633_s2 + $0x14] sm:$0xf] }
   0x5   :  { %vm224_vm2 = vcmp.lt.s32.totalorder %v590_v14, 9  ;;  %122 = vst [vmem:[#allocation4] sm:$0xf] %v465_v33  ;;  %124 = vst [vmem:[#allocation4 + $0x4] sm:$0xf] %v466_v34 }
   0x9   :  { %v526_v5 = vld [vmem:[#allocation3] sm:$0xff]  }
   0xa   :  { %v478_v6 = vld [vmem:[#allocation2] sm:$0xff]   ;;  %v181_v7 = vsel %vm176_vm1, %v526_v5, 0 }
   0xb   :  { %v479_v8 = vunpack.c.l.bf16 %v478_v6  ;;  %v480_v9 = vunpack.c.h.bf16 %v478_v6  ;;  %495 = vmatpush3.bf16.xpose.msra.mxu0 %v181_v7 }
   0xc   :  { %512 = vmatprep.subr.bf16.mxu0 %v544_v2  ;;  %v527_v35 = vld [vmem:[#allocation4] sm:$0xff]  }
   0xd   :  { %v168_v10 = vmul.f32 0.125, %v479_v8  ;;  %v169_v11 = vmul.f32 0.125, %v480_v9  ;;  %501 = vmatpush3.bf16.msra.mxu1 %v527_v35 }
   0xe   :  { %506 = vmatprep.subr.bf16.mxu1 %v544_v2 }
   0xf   :  { %v170_v12 = vpack.c.bf16 %v169_v11, %v168_v10 }
  0x12   :  { %497 = vmatmul.mubr.msk.bf16.vlgmr.msra.gmra.mrb[0].mxu0 %vm176_vm1, %v170_v12 }
  0x13   :  { %514 = vmatprep.mubr.msk.bf16.mxu0 %vm545_vm0, %v544_v2 }
  0xe5   :  { %v217_v15 = vpop.f32.mrb[0].mxu0 }
  0xe6   :  { %v225_v16 = vsel %vm224_vm2, %v217_v15, -1e+30  ;;  %v498_v17 = vpop.f32.mrb[1].mxu0 }
  0xe7   :  { %v220_v18 = vpop.f32.mrb[2].mxu0  ;;  %v228_v19 = vsel %vm227_vm3, %v225_v16, -inf }
  0xe8   :  { %v226_v20 = vsel %vm224_vm2, %v220_v18, -1e+30  ;;  %229 = vmax.xlane.f32.xlu0 %v228_v19  ;;  %v499_v21 = vpop.f32.mrb[3].mxu0 }
  0xe9   :  { %v231_v22 = vsel %vm227_vm3, %v226_v20, -inf }
  0xec   :  { %232 = vmax.xlane.f32.xlu0 %v231_v22 }
 0x102   :  { %304 = vrot.lane.b32.xlu0 %v526_v5, %s546_s0 }
 0x175   :  { %v230_v23 = vpop.xlane.xlu0 %229 }
 0x176   :  { %v234_v24 = vsub.f32 %v225_v16, %v230_v23 }
 0x178   :  { %v236_v25 = vmul.f32 1.442695, %v234_v24 }
 0x179   :  { %v233_v26 = vpop.xlane.xlu0 %232 }
 0x17a   :  { %528 = vpow2.f32 %v236_v25  ;;  %v235_v27 = vsub.f32 %v226_v20, %v233_v26 }
 0x17c   :  { %v238_v28 = vmul.f32 1.442695, %v235_v27 }
 0x17d   :  { %v305_v40 = vpop.permute.xlu0 %304 }
 0x17e   :  { %530 = vpow2.f32 %v238_v28  ;;  %v310_v43 = vsel %vm176_vm1, %v305_v40, 0 }
 0x184   :  { %v529_v29 = vpop.eup %528 }
 0x185   :  { %v240_v30 = vsel %vm227_vm3, %v529_v29, 0.0 }
 0x186   :  { %241 = vadd.xlane.f32.xlu1 %v240_v30 }
 0x188   :  { %v531_v31 = vpop.eup %530 }
 0x189   :  { %v243_v32 = vsel %vm227_vm3, %v531_v31, 0.0 }
 0x18a   :  { %244 = vadd.xlane.f32.xlu1 %v243_v32 }
 0x19b   :  { %302 = vrot.lane.b32.xlu1 %v170_v12, %s546_s0 }
 0x213   :  { %v242_v36 = vpop.xlane.xlu1 %241 }
 0x214   :  { %532 = vrcp.f32 %v242_v36 }
 0x217   :  { %v245_v37 = vpop.xlane.xlu1 %244 }
 0x218   :  { %534 = vrcp.f32 %v245_v37 }
 0x21b   :  { %v303_v45 = vpop.permute.xlu1 %302 }
 0x21e   :  { %v533_v38 = vpop.eup %532 }
 0x21f   :  { %v248_v41 = vmul.f32 %v533_v38, %v529_v29 }
 0x222   :  { %v535_v39 = vpop.eup %534 }
 0x223   :  { %v249_v42 = vmul.f32 %v535_v39, %v531_v31 }
 0x225   :  { %v250_v44 = vpack.c.bf16 %v249_v42, %v248_v41 }
 0x227   :  { %503 = vmatmul.mubr.msk.bf16.vlgmr.msra.gmra.mrb[0].mxu1 %vm227_vm3, %v250_v44 }
 0x228   :  { %507 = vmatpush3.bf16.xpose.msra.mxu1 %v310_v43  ;;  %508 = vmatprep.mubr.msk.bf16.mxu1 %vm545_vm0, %v544_v2 }
 0x22f   :  { %509 = vmatmul.mubr.msk.bf16.vlgmr.msra.gmra.mrb[4].mxu1 %vm176_vm1, %v303_v45 }
 0x2fa   :  { %v294_v46 = vpop.f32.mrb[0].mxu1 }
 0x2fb   :  { %v504_v47 = vpop.f32.mrb[1].mxu1 }
 0x2fc   :  { %v297_v48 = vpop.f32.mrb[2].mxu1 }
 0x2fd   :  { %v505_v49 = vpop.f32.mrb[3].mxu1 }
 0x302   :  { %v346_v50 = vpop.f32.mrb[4].mxu1 }
 0x303   :  { %v353_v51 = vsel %vm224_vm2, %v346_v50, -1e+30  ;;  %v510_v52 = vpop.f32.mrb[5].mxu1 }
 0x304   :  { %v349_v53 = vpop.f32.mrb[6].mxu1  ;;  %v355_v54 = vsel %vm227_vm3, %v353_v51, -inf }
 0x305   :  { %v354_v55 = vsel %vm224_vm2, %v349_v53, -1e+30  ;;  %356 = vmax.xlane.f32.xlu1 %v355_v54  ;;  %v511_v56 = vpop.f32.mrb[7].mxu1 }
 0x306   :  { %v358_v57 = vsel %vm227_vm3, %v354_v55, -inf }
 0x307   :  { %359 = vmax.xlane.f32.xlu0 %v358_v57 }
 0x392   :  { %v357_v58 = vpop.xlane.xlu1 %356 }
 0x393   :  { %v361_v59 = vsub.f32 %v353_v51, %v357_v58 }
 0x394   :  { %v360_v60 = vpop.xlane.xlu0 %359 }
 0x395   :  { %v363_v61 = vmul.f32 1.442695, %v361_v59  ;;  %v362_v62 = vsub.f32 %v354_v55, %v360_v60 }
 0x397   :  { %536 = vpow2.f32 %v363_v61  ;;  %v365_v63 = vmul.f32 1.442695, %v362_v62 }
 0x399   :  { %538 = vpow2.f32 %v365_v63 }
 0x3a1   :  { %v537_v0 = vpop.eup %536 }
 0x3a2   :  { %v367_v1 = vsel %vm227_vm3, %v537_v0, 0.0 }
 0x3a3   :  { %v539_v2 = vpop.eup %538  ;;  %368 = vadd.xlane.f32.xlu0 %v367_v1 }
 0x3a4   :  { %v370_v3 = vsel %vm227_vm3, %v539_v2, 0.0 }
 0x3a5   :  { %371 = vadd.xlane.f32.xlu1 %v370_v3 }
 0x3b9   :  { %378 = vrot.lane.b32.xlu0 %v527_v35, %s546_s0 }
 0x430   :  { %v369_v4 = vpop.xlane.xlu0 %368 }
 0x431   :  { %540 = vrcp.f32 %v369_v4 }
 0x432   :  { %v372_v5 = vpop.xlane.xlu1 %371 }
 0x433   :  { %542 = vrcp.f32 %v372_v5 }
 0x434   :  { %v379_v6 = vpop.permute.xlu0 %378 }
 0x435   :  { %513 = vmatpush3.bf16.msra.mxu0 %v379_v6 }
 0x43b   :  { %v541_v7 = vpop.eup %540 }
 0x43c   :  { %v375_v9 = vmul.f32 %v541_v7, %v537_v0 }
 0x43d   :  { %v543_v8 = vpop.eup %542 }
 0x43e   :  { %v376_v10 = vmul.f32 %v543_v8, %v539_v2 }
 0x440   :  { %v377_v11 = vpack.c.bf16 %v376_v10, %v375_v9 }
 0x442   :  { %515 = vmatmul.mubr.msk.bf16.vlgmr.msra.gmra.mrb[4].mxu0 %vm227_vm3, %v377_v11 }
 0x515   :  { %v418_v12 = vpop.f32.mrb[4].mxu0 }
 0x516   :  { %v516_v13 = vpop.f32.mrb[5].mxu0 }
 0x517   :  { %v421_v14 = vpop.f32.mrb[6].mxu0 }
 0x518   :  { %v521_v15 = vpack.i.bf16 %v421_v14, %v418_v12  ;;  %v517_v16 = vpop.f32.mrb[7].mxu0 }
 0x51a   :  { %522 = vrot.lane.b32.xlu1 %v521_v15, %s546_s0 }
 0x58c   :  { %v523_v17 = vpop.permute.xlu1 %522 }
 0x58d   :  { %v525_v18 = vunpack.i.h.bf16 %v523_v17  ;;  %v524_v19 = vunpack.i.l.bf16 %v523_v17 }
 0x58f   :  { %v434_v20 = vsel %vm176_vm1, %v297_v48, %v525_v18  ;;  %v433_v21 = vsel %vm176_vm1, %v294_v46, %v524_v19 }
 0x590   :  { %v484_v22 = vpack.c.bf16 %v434_v20, %v433_v21 }
 0x592   :  { %485 = vst [vmem:[%s634_s3] sm:$0xff] %v484_v22  }

// kernel: clasp_embedder_forward.13
= control target key start
LH: loop header
LB: loop body
LE: loop exit
PB: predicated region body
PF: predicated region fallthrough
CT: control target
= control target key end

     0   :  { %v198_v0 = vmov 0.0   ;;  %vm199_vm0 = vmmov 0   ;;  %s267_s1 = inlined_call_operand.vmem [shape: bf16[128,128], index: 1, kind: input, shape index: {}]   ;;  %s268_s0 = inlined_call_operand.vmem [shape: bf16[16,128], index: 0, kind: input, shape index: {}]   ;;  %s269_s2 = inlined_call_operand.vmem [shape: f32[1,128], index: 2, kind: input, shape index: {}]   ;;  %s270_s3 = inlined_call_operand.vmem [shape: f32[16,128], index: 3, kind: input, shape index: {}]   ;;  %s271_s4 = inlined_call_operand.vmem [shape: f32[16,128], index: 4, kind: output, shape index: {}]  }
   0x1   :  { %167 = vmatprep.subr.bf16.mxu0 %v198_v0  ;;  %v189_v1 = vld [vmem:[%s267_s1] sm:$0xff]   ;;  %183 = vmatprep.mubr.msk.bf16.mxu0 %vm199_vm0, %v198_v0  ;;  %v190_v2 = vld [vmem:[%s267_s1 + $0x8] sm:$0xff]   ;;  %v191_v3 = vld [vmem:[%s267_s1 + $0x10] sm:$0xff]  }
   0x2   :  { %168 = vmatpush3.bf16.msra.mxu0 %v189_v1  ;;  %v192_v4 = vld [vmem:[%s267_s1 + $0x18] sm:$0xff]   ;;  %v193_v5 = vld [vmem:[%s267_s1 + $0x20] sm:$0xff]   ;;  %v194_v6 = vld [vmem:[%s267_s1 + $0x28] sm:$0xff]  }
   0x3   :  { %169 = vmatprep.subr.bf16.mxu0 %v198_v0  ;;  %v195_v7 = vld [vmem:[%s267_s1 + $0x30] sm:$0xff]   ;;  %v196_v8 = vld [vmem:[%s267_s1 + $0x38] sm:$0xff]   ;;  %v197_v9 = vld [vmem:[%s268_s0] sm:$0xff]  }
   0x4   :  { %v148_v10 = vld [vmem:[%s269_s2] ss:$0 sm:$0xff]  ;;  %v139_v16 = vld [vmem:[%s270_s3 + $0x8] sm:$0xff] }
   0x5   :  { %v138_v12 = vld [vmem:[%s270_s3] sm:$0xff] }
   0x6   :  { %170 = vmatpush3.bf16.msra.mxu0 %v190_v2 }
   0x7   :  { %171 = vmatprep.subr.bf16.mxu0 %v198_v0 }
   0xa   :  { %172 = vmatpush3.bf16.msra.mxu0 %v191_v3 }
   0xb   :  { %173 = vmatprep.subr.bf16.mxu0 %v198_v0 }
   0xe   :  { %174 = vmatpush3.bf16.msra.mxu0 %v192_v4 }
   0xf   :  { %175 = vmatprep.subr.bf16.mxu0 %v198_v0 }
  0x12   :  { %176 = vmatpush3.bf16.msra.mxu0 %v193_v5 }
  0x13   :  { %177 = vmatprep.subr.bf16.mxu0 %v198_v0 }
  0x16   :  { %178 = vmatpush3.bf16.msra.mxu0 %v194_v6 }
  0x17   :  { %179 = vmatprep.subr.bf16.mxu0 %v198_v0 }
  0x1a   :  { %180 = vmatpush3.bf16.msra.mxu0 %v195_v7 }
  0x1b   :  { %181 = vmatprep.subr.bf16.mxu0 %v198_v0 }
  0x1e   :  { %182 = vmatpush3.bf16.msra.mxu0 %v196_v8 }
  0x21   :  { %184 = vmatmul.mubr.bf16.vlgmr.msra.gmra.mrb[0].mxu0 %v197_v9 }
  0xf4   :  { %v131_v11 = vpop.f32.mrb[0].mxu0 }
  0xf5   :  { %v132_v13 = vadd.f32 %v148_v10, %v131_v11  ;;  %v185_v14 = vpop.f32.mrb[1].mxu0 }
  0xf6   :  { %v134_v15 = vpop.f32.mrb[2].mxu0 }
  0xf7   :  { %v140_v17 = vadd.f32 %v138_v12, %v132_v13  ;;  %v135_v18 = vadd.f32 %v148_v10, %v134_v15  ;;  %v186_v19 = vpop.f32.mrb[3].mxu0 }
  0xf9   :  { %142 = vst [vmem:[%s271_s4] sm:$0xff] %v140_v17  ;;  %v141_v20 = vadd.f32 %v139_v16, %v135_v18 }
  0xfb   :  { %143 = vst [vmem:[%s271_s4 + $0x8] sm:$0xff] %v141_v20 }

// kernel: clasp_embedder_forward.11
= control target key start
LH: loop header
LB: loop body
LE: loop exit
PB: predicated region body
PF: predicated region fallthrough
CT: control target
= control target key end

     0   :  { %v436_v3 = vmov 0.0   ;;  %v437_v30 = vmov 0   ;;  %vm438_vm0 = vmmov 0   ;;  %s579_s0 = inlined_call_operand.vmem [shape: f32[16,128], index: 0, kind: input, shape index: {}]   ;;  %s580_s3 = inlined_call_operand.vmem [shape: bf16[128,384], index: 3, kind: input, shape index: {}]   ;;  %s581_s1 = inlined_call_operand.vmem [shape: f32[1,128], index: 1, kind: input, shape index: {}]   ;;  %s582_s2 = inlined_call_operand.vmem [shape: f32[1,128], index: 2, kind: input, shape index: {}]   ;;  %s583_s4 = inlined_call_operand.vmem [shape: bf16[16,384], index: 4, kind: output, shape index: {}]  }
   0x1   :  { %v18_v0 = vld [vmem:[%s579_s0] sm:$0xff]  ;;  %v19_v1 = vld [vmem:[%s579_s0 + $0x8] sm:$0xff]  ;;  %377 = vmatprep.subr.bf16.mxu1 %v436_v3  ;;  %v410_v18 = vld [vmem:[%s580_s3 + $0x30] ss:$12 sps:$4 sm:$0xff]   ;;  %254 = vmatprep.mubr.bf16.mxu0 %v437_v30 }
   0x2   :  { %20 = vadd.xlane.f32.xlu0 %v18_v0  ;;  %v400_v2 = vld [vmem:[%s580_s3 + $0x4] ss:$12 sps:$4 sm:$0xff]   ;;  %v402_v4 = vld [vmem:[%s580_s3] ss:$12 sps:$4 sm:$0xff]   ;;  %v403_v5 = vld [vmem:[%s580_s3 + $0x8] ss:$12 sps:$4 sm:$0xff]   ;;  %393 = vmatprep.mubr.msk.bf16.mxu1 %vm438_vm0, %v436_v3 }
   0x3   :  { %222 = vmatprep.subr.bf16.mxu0 %v400_v2  ;;  %v404_v6 = vld [vmem:[%s580_s3 + $0x1c] ss:$12 sps:$4 sm:$0xff]   ;;  %378 = vmatpush3.bf16.msra.mxu1 %v403_v5  ;;  %v406_v15 = vld [vmem:[%s580_s3 + $0x18] ss:$12 sps:$4 sm:$0xff]   ;;  %v407_v16 = vld [vmem:[%s580_s3 + $0x20] ss:$12 sps:$4 sm:$0xff]  }
   0x4   :  { %223 = vmatpush1.bf16.msra.mxu0 %v402_v4  ;;  %379 = vmatprep.subr.bf16.mxu1 %v436_v3  ;;  %v408_v17 = vld [vmem:[%s580_s3 + $0x34] ss:$12 sps:$4 sm:$0xff]   ;;  %v411_v19 = vld [vmem:[%s580_s3 + $0x38] ss:$12 sps:$4 sm:$0xff]   ;;  %v415_v22 = vld [vmem:[%s580_s3 + $0x50] ss:$12 sps:$4 sm:$0xff]  }
   0x5   :  { %224 = vmatprep.subr.bf16.mxu0 %v404_v6  ;;  %v412_v20 = vld [vmem:[%s580_s3 + $0x4c] ss:$12 sps:$4 sm:$0xff]   ;;  %v414_v21 = vld [vmem:[%s580_s3 + $0x48] ss:$12 sps:$4 sm:$0xff]   ;;  %v416_v23 = vld [vmem:[%s580_s3 + $0x64] ss:$12 sps:$4 sm:$0xff]  }
   0x6   :  { %22 = vadd.xlane.f32.xlu0 %v19_v1  ;;  %v418_v24 = vld [vmem:[%s580_s3 + $0x60] ss:$12 sps:$4 sm:$0xff]   ;;  %v419_v25 = vld [vmem:[%s580_s3 + $0x68] ss:$12 sps:$4 sm:$0xff]   ;;  %v422_v27 = vld [vmem:[%s580_s3 + $0x78] ss:$12 sps:$4 sm:$0xff]  }
   0x7   :  { %380 = vmatpush3.bf16.msra.mxu1 %v407_v16  ;;  %v420_v26 = vld [vmem:[%s580_s3 + $0x7c] ss:$12 sps:$4 sm:$0xff]   ;;  %v423_v28 = vld [vmem:[%s580_s3 + $0x80] ss:$12 sps:$4 sm:$0xff]   ;;  %v427_v32 = vld [vmem:[%s580_s3 + $0x98] ss:$12 sps:$4 sm:$0xff]  }
   0x8   :  { %225 = vmatpush1.bf16.msra.mxu0 %v406_v15  ;;  %381 = vmatprep.subr.bf16.mxu1 %v436_v3  ;;  %v424_v29 = vld [vmem:[%s580_s3 + $0x94] ss:$12 sps:$4 sm:$0xff]   ;;  %v426_v31 = vld [vmem:[%s580_s3 + $0x90] ss:$12 sps:$4 sm:$0xff]   ;;  %v428_v33 = vld [vmem:[%s580_s3 + $0xac] ss:$12 sps:$4 sm:$0xff]  }
   0x9   :  { %226 = vmatprep.subr.bf16.mxu0 %v408_v17  ;;  %v430_v34 = vld [vmem:[%s580_s3 + $0xa8] ss:$12 sps:$4 sm:$0xff]   ;;  %v431_v35 = vld [vmem:[%s580_s3 + $0xb0] ss:$12 sps:$4 sm:$0xff]   ;;  %v334_v44 = vld [vmem:[%s581_s1] ss:$0 sm:$0xff] }
   0xa   :  { %v335_v48 = vld [vmem:[%s582_s2] ss:$0 sm:$0xff] }
   0xb   :  { %382 = vmatpush3.bf16.msra.mxu1 %v411_v19 }
   0xc   :  { %227 = vmatpush1.bf16.msra.mxu0 %v410_v18  ;;  %383 = vmatprep.subr.bf16.mxu1 %v436_v3 }
   0xd   :  { %228 = vmatprep.subr.bf16.mxu0 %v412_v20 }
   0xf   :  { %384 = vmatpush3.bf16.msra.mxu1 %v415_v22 }
  0x10   :  { %229 = vmatpush1.bf16.msra.mxu0 %v414_v21  ;;  %385 = vmatprep.subr.bf16.mxu1 %v436_v3 }
  0x11   :  { %230 = vmatprep.subr.bf16.mxu0 %v416_v23 }
  0x13   :  { %386 = vmatpush3.bf16.msra.mxu1 %v419_v25 }
  0x14   :  { %231 = vmatpush1.bf16.msra.mxu0 %v418_v24  ;;  %387 = vmatprep.subr.bf16.mxu1 %v436_v3 }
  0x15   :  { %232 = vmatprep.subr.bf16.mxu0 %v420_v26 }
  0x17   :  { %388 = vmatpush3.bf16.msra.mxu1 %v423_v28 }
  0x18   :  { %233 = vmatpush1.bf16.msra.mxu0 %v422_v27  ;;  %389 = vmatprep.subr.bf16.mxu1 %v436_v3 }
  0x19   :  { %234 = vmatprep.subr.bf16.mxu0 %v424_v29 }
  0x1b   :  { %390 = vmatpush3.bf16.msra.mxu1 %v427_v32 }
  0x1c   :  { %235 = vmatpush1.bf16.msra.mxu0 %v426_v31  ;;  %391 = vmatprep.subr.bf16.mxu1 %v436_v3 }
  0x1d   :  { %236 = vmatprep.subr.bf16.mxu0 %v428_v33 }
  0x1f   :  { %392 = vmatpush3.bf16.msra.mxu1 %v431_v35 }
  0x20   :  { %237 = vmatpush1.bf16.msra.mxu0 %v430_v34 }
  0x8f   :  { %v21_v7 = vpop.xlane.xlu0 %20 }
  0x90   :  { %v25_v8 = vmul.f32 0.0078125, %v21_v7 }
  0x92   :  { %v484_v9 = vsub.f32 %v18_v0, %v25_v8 }
  0x93   :  { %v23_v10 = vpop.xlane.xlu0 %22 }
  0x94   :  { %v26_v11 = vmul.f32 0.0078125, %v23_v10  ;;  %v29_v12 = vmul.f32 %v484_v9, %v484_v9 }
  0x96   :  { %v488_v13 = vsub.f32 %v19_v1, %v26_v11  ;;  %31 = vadd.xlane.f32.xlu1 %v29_v12 }
  0x98   :  { %v30_v14 = vmul.f32 %v488_v13, %v488_v13 }
  0x9a   :  { %33 = vadd.xlane.f32.xlu1 %v30_v14 }
 0x123   :  { %v32_v36 = vpop.xlane.xlu1 %31 }
 0x124   :  { %v35_v37 = vmul.f32 0.0078125, %v32_v36 }
 0x126   :  { %v37_v38 = vadd.f32 1e-05, %v35_v37 }
 0x127   :  { %v34_v39 = vpop.xlane.xlu1 %33 }
 0x128   :  { %432 = vrsqrt.f32 %v37_v38  ;;  %v36_v40 = vmul.f32 0.0078125, %v34_v39 }
 0x12a   :  { %v38_v41 = vadd.f32 1e-05, %v36_v40 }
 0x12c   :  { %434 = vrsqrt.f32 %v38_v41 }
 0x132   :  { %v433_v42 = vpop.eup %432 }
 0x133   :  { %v41_v43 = vmul.f32 %v433_v42, %v484_v9 }
 0x135   :  { %v50_v47 = vmul.f32 %v334_v44, %v41_v43 }
 0x136   :  { %v435_v45 = vpop.eup %434 }
 0x137   :  { %v42_v46 = vmul.f32 %v435_v45, %v488_v13  ;;  %v59_v50 = vadd.f32 %v335_v48, %v50_v47 }
 0x139   :  { %v51_v49 = vmul.f32 %v334_v44, %v42_v46 }
 0x13b   :  { %v60_v51 = vadd.f32 %v335_v48, %v51_v49 }
 0x13d   :  { %v61_v52 = vpack.c.bf16 %v60_v51, %v59_v50 }
 0x13f   :  { %255 = vmatmul.mubr.bf16.vlgmr.msra.gmra.mrb[0].mxu0 %v61_v52  ;;  %394 = vmatmul.mubr.bf16.vlgmr.msra.gmra.mrb[0].mxu1 %v61_v52 }
 0x212   :  { %v256_v53 = vpop.f32.mrb[0].mxu0  ;;  %v299_v54 = vpop.f32.mrb[0].mxu1 }
 0x213   :  { %v365_v55 = vpack.c.bf16 %v299_v54, %v299_v54  ;;  %v258_v56 = vpop.f32.mrb[1].mxu0  ;;  %v395_v57 = vpop.f32.mrb[1].mxu1 }
 0x214   :  { %v364_v58 = vpack.c.bf16 %v258_v56, %v256_v53  ;;  %v260_v59 = vpop.f32.mrb[2].mxu0  ;;  %v302_v60 = vpop.f32.mrb[2].mxu1 }
 0x215   :  { %327 = vst [vmem:[%s583_s4 + $0x8] sm:$0xf] %v365_v55  ;;  %v367_v61 = vpack.c.bf16 %v302_v60, %v302_v60  ;;  %v262_v62 = vpop.f32.mrb[3].mxu0  ;;  %v396_v63 = vpop.f32.mrb[3].mxu1 }
 0x216   :  { %326 = vst [vmem:[%s583_s4] sm:$0xff] %v364_v58  ;;  %v366_v0 = vpack.c.bf16 %v262_v62, %v260_v59 }
 0x217   :  { %329 = vst [vmem:[%s583_s4 + $0x14] sm:$0xf] %v367_v61 }
 0x218   :  { %328 = vst [vmem:[%s583_s4 + $0xc] sm:$0xff] %v366_v0 }

// kernel: clasp_embedder_forward.14
= control target key start
LH: loop header
LB: loop body
LE: loop exit
PB: predicated region body
PF: predicated region fallthrough
CT: control target
= control target key end

     0   :  { %v548_v36 = vmov 0   ;;  %v99_v60 = vlaneseq  ;;  %s712_s0 = inlined_call_operand.vmem [shape: f32[16,128], index: 0, kind: input, shape index: {}]   ;;  %s713_s3 = inlined_call_operand.vmem [shape: bf16[128,512], index: 3, kind: input, shape index: {}]   ;;  %s714_s1 = inlined_call_operand.vmem [shape: f32[1,128], index: 1, kind: input, shape index: {}]   ;;  %s715_s2 = inlined_call_operand.vmem [shape: f32[1,128], index: 2, kind: input, shape index: {}]   ;;  %s716_s4 = inlined_call_operand.vmem [shape: f32[1,512], index: 4, kind: input, shape index: {}]   ;;  %s717_s5 = inlined_call_operand.vmem [shape: bf16[16,512], index: 5, kind: output, shape index: {}]  }
   0x1   :  { %v21_v0 = vld [vmem:[%s712_s0] sm:$0xff]  ;;  %v22_v1 = vld [vmem:[%s712_s0 + $0x8] sm:$0xff]  ;;  %311 = vmatprep.mubr.bf16.mxu0 %v548_v36  ;;  %354 = vmatprep.mubr.bf16.mxu1 %v548_v36 }
   0x2   :  { %23 = vadd.xlane.f32.xlu0 %v21_v0  ;;  %v480_v2 = vld [vmem:[%s713_s3 + $0x4] ss:$16 sps:$4 sm:$0xff]   ;;  %v482_v3 = vld [vmem:[%s713_s3 + $0xc] ss:$16 sps:$4 sm:$0xff]   ;;  %v484_v4 = vld [vmem:[%s713_s3] ss:$16 sps:$4 sm:$0xff]  }
   0x3   :  { %279 = vmatprep.subr.bf16.mxu0 %v480_v2  ;;  %v485_v5 = vld [vmem:[%s713_s3 + $0x8] ss:$16 sps:$4 sm:$0xff]   ;;  %322 = vmatprep.subr.bf16.mxu1 %v482_v3  ;;  %v486_v6 = vld [vmem:[%s713_s3 + $0x24] ss:$16 sps:$4 sm:$0xff]   ;;  %v488_v7 = vld [vmem:[%s713_s3 + $0x2c] ss:$16 sps:$4 sm:$0xff]  }
   0x4   :  { %280 = vmatpush1.bf16.msra.mxu0 %v484_v4  ;;  %323 = vmatpush1.bf16.msra.mxu1 %v485_v5  ;;  %v490_v16 = vld [vmem:[%s713_s3 + $0x20] ss:$16 sps:$4 sm:$0xff]   ;;  %v491_v17 = vld [vmem:[%s713_s3 + $0x28] ss:$16 sps:$4 sm:$0xff]   ;;  %v492_v18 = vld [vmem:[%s713_s3 + $0x44] ss:$16 sps:$4 sm:$0xff]  }
   0x5   :  { %281 = vmatprep.subr.bf16.mxu0 %v486_v6  ;;  %324 = vmatprep.subr.bf16.mxu1 %v488_v7  ;;  %v494_v19 = vld [vmem:[%s713_s3 + $0x4c] ss:$16 sps:$4 sm:$0xff]   ;;  %v496_v20 = vld [vmem:[%s713_s3 + $0x40] ss:$16 sps:$4 sm:$0xff]   ;;  %v497_v21 = vld [vmem:[%s713_s3 + $0x48] ss:$16 sps:$4 sm:$0xff]  }
   0x6   :  { %25 = vadd.xlane.f32.xlu0 %v22_v1  ;;  %v498_v22 = vld [vmem:[%s713_s3 + $0x64] ss:$16 sps:$4 sm:$0xff]   ;;  %v500_v23 = vld [vmem:[%s713_s3 + $0x6c] ss:$16 sps:$4 sm:$0xff]   ;;  %v502_v24 = vld [vmem:[%s713_s3 + $0x60] ss:$16 sps:$4 sm:$0xff]  }
   0x7   :  { %v503_v25 = vld [vmem:[%s713_s3 + $0x68] ss:$16 sps:$4 sm:$0xff]   ;;  %v504_v26 = vld [vmem:[%s713_s3 + $0x84] ss:$16 sps:$4 sm:$0xff]   ;;  %v506_v27 = vld [vmem:[%s713_s3 + $0x8c] ss:$16 sps:$4 sm:$0xff]  }
   0x8   :  { %282 = vmatpush1.bf16.msra.mxu0 %v490_v16  ;;  %325 = vmatpush1.bf16.msra.mxu1 %v491_v17  ;;  %v508_v28 = vld [vmem:[%s713_s3 + $0x80] ss:$16 sps:$4 sm:$0xff]   ;;  %v509_v29 = vld [vmem:[%s713_s3 + $0x88] ss:$16 sps:$4 sm:$0xff]   ;;  %v510_v30 = vld [vmem:[%s713_s3 + $0xa4] ss:$16 sps:$4 sm:$0xff]  }
   0x9   :  { %283 = vmatprep.subr.bf16.mxu0 %v492_v18  ;;  %326 = vmatprep.subr.bf16.mxu1 %v494_v19  ;;  %v512_v31 = vld [vmem:[%s713_s3 + $0xac] ss:$16 sps:$4 sm:$0xff]   ;;  %v514_v32 = vld [vmem:[%s713_s3 + $0xa0] ss:$16 sps:$4 sm:$0xff]   ;;  %v515_v33 = vld [vmem:[%s713_s3 + $0xa8] ss:$16 sps:$4 sm:$0xff]  }
   0xa   :  { %v516_v34 = vld [vmem:[%s713_s3 + $0xc4] ss:$16 sps:$4 sm:$0xff]   ;;  %v518_v35 = vld [vmem:[%s713_s3 + $0xcc] ss:$16 sps:$4 sm:$0xff]   ;;  %v520_v37 = vld [vmem:[%s713_s3 + $0xc0] ss:$16 sps:$4 sm:$0xff]  }
   0xb   :  { %v521_v38 = vld [vmem:[%s713_s3 + $0xc8] ss:$16 sps:$4 sm:$0xff]   ;;  %v522_v39 = vld [vmem:[%s713_s3 + $0xe4] ss:$16 sps:$4 sm:$0xff]   ;;  %v524_v40 = vld [vmem:[%s713_s3 + $0xec] ss:$16 sps:$4 sm:$0xff]  }
   0xc   :  { %284 = vmatpush1.bf16.msra.mxu0 %v496_v20  ;;  %327 = vmatpush1.bf16.msra.mxu1 %v497_v21  ;;  %v526_v41 = vld [vmem:[%s713_s3 + $0xe0] ss:$16 sps:$4 sm:$0xff]   ;;  %v527_v42 = vld [vmem:[%s713_s3 + $0xe8] ss:$16 sps:$4 sm:$0xff]   ;;  %v100_v61 = vshrl.u32 %v99_v60, 7 }
   0xd   :  { %285 = vmatprep.subr.bf16.mxu0 %v498_v22  ;;  %328 = vmatprep.subr.bf16.mxu1 %v500_v23  ;;  %v437_v51 = vld [vmem:[%s714_s1] ss:$0 sm:$0xff] }
   0xe   :  { %v438_v55 = vld [vmem:[%s715_s2] ss:$0 sm:$0xff]  ;;  %v101_v62 = vsub.s32 0, %v100_v61  ;;  %v109_v63 = vsub.s32 2, %v100_v61  ;;  %v113_v2 = vsub.s32 3, %v100_v61 }
  0x10   :  { %286 = vmatpush1.bf16.msra.mxu0 %v502_v24  ;;  %329 = vmatpush1.bf16.msra.mxu1 %v503_v25 }
  0x11   :  { %287 = vmatprep.subr.bf16.mxu0 %v504_v26  ;;  %330 = vmatprep.subr.bf16.mxu1 %v506_v27 }
  0x14   :  { %288 = vmatpush1.bf16.msra.mxu0 %v508_v28  ;;  %331 = vmatpush1.bf16.msra.mxu1 %v509_v29 }
  0x15   :  { %289 = vmatprep.subr.bf16.mxu0 %v510_v30  ;;  %332 = vmatprep.subr.bf16.mxu1 %v512_v31 }
  0x18   :  { %290 = vmatpush1.bf16.msra.mxu0 %v514_v32  ;;  %333 = vmatpush1.bf16.msra.mxu1 %v515_v33 }
  0x19   :  { %291 = vmatprep.subr.bf16.mxu0 %v516_v34  ;;  %334 = vmatprep.subr.bf16.mxu1 %v518_v35 }
  0x1c   :  { %292 = vmatpush1.bf16.msra.mxu0 %v520_v37  ;;  %335 = vmatpush1.bf16.msra.mxu1 %v521_v38 }
  0x1d   :  { %293 = vmatprep.subr.bf16.mxu0 %v522_v39  ;;  %336 = vmatprep.subr.bf16.mxu1 %v524_v40 }
  0x20   :  { %294 = vmatpush1.bf16.msra.mxu0 %v526_v41  ;;  %337 = vmatpush1.bf16.msra.mxu1 %v527_v42 }
  0x8f   :  { %v24_v8 = vpop.xlane.xlu0 %23 }
  0x90   :  { %v28_v9 = vmul.f32 0.0078125, %v24_v8 }
  0x92   :  { %v603_v10 = vsub.f32 %v21_v0, %v28_v9  ;;  %v97_v0 = vld [vmem:[%s716_s4] sm:$0xf] }
  0x93   :  { %v26_v11 = vpop.xlane.xlu0 %25  ;;  %v102_v3 = vrot.slane %v97_v0, %v101_v62  ;;  %v110_v4 = vrot.slane %v97_v0, %v109_v63  ;;  %v114_v6 = vrot.slane %v97_v0, %v113_v2 }
  0x94   :  { %v29_v12 = vmul.f32 0.0078125, %v26_v11  ;;  %v32_v13 = vmul.f32 %v603_v10, %v603_v10 }
  0x96   :  { %v607_v14 = vsub.f32 %v22_v1, %v29_v12  ;;  %34 = vadd.xlane.f32.xlu1 %v32_v13  ;;  %v105_v1 = vsub.s32 1, %v100_v61 }
  0x98   :  { %v33_v15 = vmul.f32 %v607_v14, %v607_v14  ;;  %v106_v5 = vrot.slane %v97_v0, %v105_v1 }
  0x9a   :  { %36 = vadd.xlane.f32.xlu1 %v33_v15 }
 0x123   :  { %v35_v43 = vpop.xlane.xlu1 %34 }
 0x124   :  { %v38_v44 = vmul.f32 0.0078125, %v35_v43 }
 0x126   :  { %v40_v45 = vadd.f32 1e-05, %v38_v44 }
 0x127   :  { %v37_v46 = vpop.xlane.xlu1 %36 }
 0x128   :  { %528 = vrsqrt.f32 %v40_v45  ;;  %v39_v47 = vmul.f32 0.0078125, %v37_v46 }
 0x12a   :  { %v41_v48 = vadd.f32 1e-05, %v39_v47 }
 0x12c   :  { %530 = vrsqrt.f32 %v41_v48 }
 0x132   :  { %v529_v49 = vpop.eup %528 }
 0x133   :  { %v44_v50 = vmul.f32 %v529_v49, %v603_v10 }
 0x135   :  { %v53_v54 = vmul.f32 %v437_v51, %v44_v50 }
 0x136   :  { %v531_v52 = vpop.eup %530 }
 0x137   :  { %v45_v53 = vmul.f32 %v531_v52, %v607_v14  ;;  %v62_v57 = vadd.f32 %v438_v55, %v53_v54 }
 0x139   :  { %v54_v56 = vmul.f32 %v437_v51, %v45_v53 }
 0x13b   :  { %v63_v58 = vadd.f32 %v438_v55, %v54_v56 }
 0x13d   :  { %v64_v59 = vpack.c.bf16 %v63_v58, %v62_v57 }
 0x13f   :  { %312 = vmatmul.mubr.bf16.vlgmr.msra.gmra.mrb[0].mxu0 %v64_v59  ;;  %355 = vmatmul.mubr.bf16.vlgmr.msra.gmra.mrb[0].mxu1 %v64_v59 }
 0x212   :  { %v313_v7 = vpop.f32.mrb[0].mxu0  ;;  %v356_v8 = vpop.f32.mrb[0].mxu1 }
 0x213   :  { %v314_v9 = vadd.f32 %v313_v7, %v102_v3  ;;  %v357_v10 = vadd.f32 %v356_v8, %v110_v4  ;;  %v315_v11 = vpop.f32.mrb[1].mxu0  ;;  %v358_v12 = vpop.f32.mrb[1].mxu1 }
 0x214   :  { %v316_v13 = vadd.f32 %v315_v11, %v106_v5  ;;  %v359_v14 = vadd.f32 %v358_v12, %v114_v6  ;;  %v317_v15 = vpop.f32.mrb[2].mxu0  ;;  %v360_v16 = vpop.f32.mrb[2].mxu1 }
 0x215   :  { %v373_v17 = vmul.f32 0.70710677, %v314_v9  ;;  %v375_v18 = vmul.f32 0.70710677, %v357_v10  ;;  %v318_v21 = vadd.f32 %v317_v15, %v102_v3  ;;  %v361_v22 = vadd.f32 %v360_v16, %v110_v4  ;;  %v319_v23 = vpop.f32.mrb[3].mxu0  ;;  %v362_v24 = vpop.f32.mrb[3].mxu1 }
 0x216   :  { %v374_v19 = vmul.f32 0.70710677, %v316_v13  ;;  %v376_v20 = vmul.f32 0.70710677, %v359_v14  ;;  %v320_v25 = vadd.f32 %v319_v23, %v106_v5  ;;  %v363_v26 = vadd.f32 %v362_v24, %v114_v6 }
 0x217   :  { %532 = verf.f32 %v373_v17  ;;  %v377_v27 = vmul.f32 0.70710677, %v318_v21  ;;  %v379_v28 = vmul.f32 0.70710677, %v361_v22  ;;  %v365_v33 = vmul.f32 0.5, %v314_v9 }
 0x218   :  { %534 = verf.f32 %v375_v18  ;;  %v378_v29 = vmul.f32 0.70710677, %v320_v25  ;;  %v380_v30 = vmul.f32 0.70710677, %v363_v26  ;;  %v367_v36 = vmul.f32 0.5, %v357_v10 }
 0x219   :  { %536 = verf.f32 %v374_v19  ;;  %v366_v40 = vmul.f32 0.5, %v316_v13  ;;  %v368_v44 = vmul.f32 0.5, %v359_v14  ;;  %v369_v48 = vmul.f32 0.5, %v318_v21 }
 0x21a   :  { %538 = verf.f32 %v376_v20  ;;  %v371_v52 = vmul.f32 0.5, %v361_v22  ;;  %v370_v57 = vmul.f32 0.5, %v320_v25  ;;  %v372_v61 = vmul.f32 0.5, %v363_v26 }
 0x21b   :  { %540 = verf.f32 %v377_v27 }
 0x21c   :  { %542 = verf.f32 %v379_v28 }
 0x21d   :  { %544 = verf.f32 %v378_v29 }
 0x21e   :  { %546 = verf.f32 %v380_v30 }
 0x221   :  { %v533_v31 = vpop.eup %532 }
 0x222   :  { %v535_v32 = vpop.eup %534  ;;  %v389_v34 = vadd.f32 1.0, %v533_v31 }
 0x223   :  { %v537_v35 = vpop.eup %536  ;;  %v391_v37 = vadd.f32 1.0, %v535_v32 }
 0x224   :  { %v539_v38 = vpop.eup %538  ;;  %v397_v39 = vmul.f32 %v389_v34, %v365_v33  ;;  %v390_v41 = vadd.f32 1.0, %v537_v35 }
 0x225   :  { %v541_v42 = vpop.eup %540  ;;  %v399_v43 = vmul.f32 %v391_v37, %v367_v36  ;;  %v392_v45 = vadd.f32 1.0, %v539_v38 }
 0x226   :  { %v543_v46 = vpop.eup %542  ;;  %v398_v47 = vmul.f32 %v390_v41, %v366_v40  ;;  %v393_v49 = vadd.f32 1.0, %v541_v42 }
 0x227   :  { %v545_v50 = vpop.eup %544  ;;  %v400_v51 = vmul.f32 %v392_v45, %v368_v44  ;;  %v395_v53 = vadd.f32 1.0, %v543_v46 }
 0x228   :  { %v547_v54 = vpop.eup %546  ;;  %v475_v55 = vpack.c.bf16 %v398_v47, %v397_v39  ;;  %v401_v56 = vmul.f32 %v393_v49, %v369_v48  ;;  %v394_v58 = vadd.f32 1.0, %v545_v50 }
 0x229   :  { %v476_v59 = vpack.c.bf16 %v400_v51, %v399_v43  ;;  %v403_v60 = vmul.f32 %v395_v53, %v371_v52  ;;  %v396_v62 = vadd.f32 1.0, %v547_v54 }
 0x22a   :  { %429 = vst [vmem:[%s717_s5] sm:$0xff] %v475_v55  ;;  %v402_v63 = vmul.f32 %v394_v58, %v370_v57 }
 0x22b   :  { %430 = vst [vmem:[%s717_s5 + $0x8] sm:$0xff] %v476_v59  ;;  %v404_v0 = vmul.f32 %v396_v62, %v372_v61 }
 0x22c   :  { %v477_v1 = vpack.c.bf16 %v402_v63, %v401_v56 }
 0x22d   :  { %v478_v2 = vpack.c.bf16 %v404_v0, %v403_v60 }
 0x22e   :  { %431 = vst [vmem:[%s717_s5 + $0x10] sm:$0xff] %v477_v1 }
 0x22f   :  { %432 = vst [vmem:[%s717_s5 + $0x18] sm:$0xff] %v478_v2 }

// kernel: clasp_embedder_forward.21
= control target key start
LH: loop header
LB: loop body
LE: loop exit
PB: predicated region body
PF: predicated region fallthrough
CT: control target
= control target key end

     0   :  { %s127_s0 = inlined_call_operand.vmem [shape: f32[16,128], index: 0, kind: input, shape index: {}]   ;;  %s128_s1 = inlined_call_operand.vmem [shape: f32[16,128], index: 1, kind: input, shape index: {}]   ;;  %s129_s2 = inlined_call_operand.vmem [shape: f32[1,128], index: 2, kind: input, shape index: {}]   ;;  %s130_s3 = inlined_call_operand.vmem [shape: f32[1,128], index: 3, kind: input, shape index: {}]   ;;  %s131_s4 = inlined_call_operand.vmem [shape: f32[16,128], index: 4, kind: output, shape index: {}]  }
   0x1   :  { %v17_v0 = vld [vmem:[%s127_s0] sm:$0xff]  ;;  %v18_v2 = vld [vmem:[%s127_s0 + $0x8] sm:$0xff] }
   0x2   :  { %v19_v1 = vld [vmem:[%s128_s1] sm:$0xff]  ;;  %v20_v4 = vld [vmem:[%s128_s1 + $0x8] sm:$0xff] }
   0x3   :  { %v21_v3 = vadd.f32 %v19_v1, %v17_v0  ;;  %v22_v5 = vadd.f32 %v20_v4, %v18_v2  ;;  %v72_v23 = vld [vmem:[%s129_s2] ss:$0 sm:$0xff] }
   0x4   :  { %v73_v25 = vld [vmem:[%s130_s3] ss:$0 sm:$0xff] }
   0x5   :  { %v23_v6 = vmul.f32 0.5, %v21_v3  ;;  %v24_v7 = vmul.f32 0.5, %v22_v5 }
   0x7   :  { %25 = vadd.xlane.f32.xlu0 %v23_v6 }
   0xb   :  { %27 = vadd.xlane.f32.xlu0 %v24_v7 }
  0x94   :  { %v26_v8 = vpop.xlane.xlu0 %25 }
  0x95   :  { %v30_v9 = vmul.f32 0.0078125, %v26_v8 }
  0x97   :  { %v32_v10 = vsub.f32 %v23_v6, %v30_v9 }
  0x98   :  { %v28_v11 = vpop.xlane.xlu0 %27 }
  0x99   :  { %v31_v12 = vmul.f32 0.0078125, %v28_v11  ;;  %v34_v13 = vmul.f32 %v32_v10, %v32_v10 }
  0x9b   :  { %v33_v14 = vsub.f32 %v24_v7, %v31_v12  ;;  %36 = vadd.xlane.f32.xlu1 %v34_v13 }
  0x9d   :  { %v35_v15 = vmul.f32 %v33_v14, %v33_v14 }
  0x9f   :  { %38 = vadd.xlane.f32.xlu1 %v35_v15 }
 0x128   :  { %v37_v16 = vpop.xlane.xlu1 %36 }
 0x129   :  { %v40_v17 = vmul.f32 0.0078125, %v37_v16 }
 0x12b   :  { %v42_v18 = vadd.f32 1e-05, %v40_v17 }
 0x12c   :  { %v39_v19 = vpop.xlane.xlu1 %38 }
 0x12d   :  { %74 = vrsqrt.f32 %v42_v18  ;;  %v41_v20 = vmul.f32 0.0078125, %v39_v19 }
 0x12f   :  { %v43_v21 = vadd.f32 1e-05, %v41_v20 }
 0x131   :  { %76 = vrsqrt.f32 %v43_v21 }
 0x137   :  { %v75_v22 = vpop.eup %74 }
 0x138   :  { %v46_v24 = vmul.f32 %v75_v22, %v32_v10 }
 0x13a   :  { %v55_v26 = vmul.f32 %v72_v23, %v46_v24 }
 0x13b   :  { %v77_v27 = vpop.eup %76 }
 0x13c   :  { %v64_v28 = vadd.f32 %v73_v25, %v55_v26  ;;  %v47_v29 = vmul.f32 %v77_v27, %v33_v14 }
 0x13e   :  { %66 = vst [vmem:[%s131_s4] sm:$0xff] %v64_v28  ;;  %v56_v30 = vmul.f32 %v72_v23, %v47_v29 }
 0x140   :  { %v65_v31 = vadd.f32 %v73_v25, %v56_v30 }
 0x142   :  { %67 = vst [vmem:[%s131_s4 + $0x8] sm:$0xff] %v65_v31 }

// kernel: clasp_embedder_forward.15
= control target key start
LH: loop header
LB: loop body
LE: loop exit
PB: predicated region body
PF: predicated region fallthrough
CT: control target
= control target key end

     0   :  { %s664_s1 = inlined_call_operand.vmem [shape: bf16[512,128], index: 1, kind: input, shape index: {}]   ;;  %s665_s0 = inlined_call_operand.vmem [shape: bf16[16,512], index: 0, kind: input, shape index: {}]   ;;  %s666_s2 = inlined_call_operand.vmem [shape: f32[1,128], index: 2, kind: input, shape index: {}]   ;;  %s667_s3 = inlined_call_operand.vmem [shape: f32[16,128], index: 3, kind: input, shape index: {}]   ;;  %s668_s4 = inlined_call_operand.vmem [shape: f32[16,128], index: 4, kind: output, shape index: {}]  }
   0x1   :  { %v478_v0 = vld [vmem:[%s664_s1 + $0x40] sm:$0xff]   ;;  %v482_v4 = vld [vmem:[%s664_s1 + $0x48] sm:$0xff]   ;;  %v486_v8 = vld [vmem:[%s664_s1 + $0x50] sm:$0xff]  }
   0x2   :  { %v479_v1 = vld [vmem:[%s664_s1 + $0xc0] sm:$0xff]   ;;  %434 = vmatprep.subr.bf16.mxu0 %v478_v0  ;;  %v483_v5 = vld [vmem:[%s664_s1 + $0xc8] sm:$0xff]   ;;  %v487_v9 = vld [vmem:[%s664_s1 + $0xd0] sm:$0xff]  }
   0x3   :  { %v480_v2 = vld [vmem:[%s664_s1] sm:$0xff]   ;;  %456 = vmatprep.subr.bf16.mxu1 %v479_v1  ;;  %v484_v6 = vld [vmem:[%s664_s1 + $0x8] sm:$0xff]   ;;  %v488_v10 = vld [vmem:[%s664_s1 + $0x10] sm:$0xff]  }
   0x4   :  { %v481_v3 = vld [vmem:[%s664_s1 + $0x80] sm:$0xff]   ;;  %435 = vmatpush3.bf16.msra.mxu0 %v480_v2  ;;  %v485_v7 = vld [vmem:[%s664_s1 + $0x88] sm:$0xff]   ;;  %v489_v11 = vld [vmem:[%s664_s1 + $0x90] sm:$0xff]  }
   0x5   :  { %457 = vmatpush3.bf16.msra.mxu1 %v481_v3  ;;  %436 = vmatprep.subr.bf16.mxu0 %v482_v4  ;;  %v490_v12 = vld [vmem:[%s664_s1 + $0x58] sm:$0xff]   ;;  %v494_v16 = vld [vmem:[%s664_s1 + $0x60] sm:$0xff]   ;;  %v498_v20 = vld [vmem:[%s664_s1 + $0x68] sm:$0xff]  }
   0x6   :  { %458 = vmatprep.subr.bf16.mxu1 %v483_v5  ;;  %v491_v13 = vld [vmem:[%s664_s1 + $0xd8] sm:$0xff]   ;;  %v495_v17 = vld [vmem:[%s664_s1 + $0xe0] sm:$0xff]   ;;  %v499_v21 = vld [vmem:[%s664_s1 + $0xe8] sm:$0xff]  }
   0x7   :  { %v492_v14 = vld [vmem:[%s664_s1 + $0x18] sm:$0xff]   ;;  %v496_v18 = vld [vmem:[%s664_s1 + $0x20] sm:$0xff]   ;;  %v500_v22 = vld [vmem:[%s664_s1 + $0x28] sm:$0xff]  }
   0x8   :  { %437 = vmatpush3.bf16.msra.mxu0 %v484_v6  ;;  %v493_v15 = vld [vmem:[%s664_s1 + $0x98] sm:$0xff]   ;;  %v497_v19 = vld [vmem:[%s664_s1 + $0xa0] sm:$0xff]   ;;  %v501_v23 = vld [vmem:[%s664_s1 + $0xa8] sm:$0xff]  }
   0x9   :  { %459 = vmatpush3.bf16.msra.mxu1 %v485_v7  ;;  %438 = vmatprep.subr.bf16.mxu0 %v486_v8  ;;  %v502_v24 = vld [vmem:[%s664_s1 + $0x70] sm:$0xff]   ;;  %v506_v28 = vld [vmem:[%s664_s1 + $0x78] sm:$0xff]   ;;  %v397_v38 = vld [vmem:[%s666_s2] ss:$0 sm:$0xff] }
   0xa   :  { %460 = vmatprep.subr.bf16.mxu1 %v487_v9  ;;  %v503_v25 = vld [vmem:[%s664_s1 + $0xf0] sm:$0xff]   ;;  %v507_v29 = vld [vmem:[%s664_s1 + $0xf8] sm:$0xff]   ;;  %v387_v49 = vld [vmem:[%s667_s3] sm:$0xff] }
   0xb   :  { %v504_v26 = vld [vmem:[%s664_s1 + $0x30] sm:$0xff]   ;;  %v508_v30 = vld [vmem:[%s664_s1 + $0x38] sm:$0xff]   ;;  %v388_v53 = vld [vmem:[%s667_s3 + $0x8] sm:$0xff] }
   0xc   :  { %439 = vmatpush3.bf16.msra.mxu0 %v488_v10  ;;  %v505_v27 = vld [vmem:[%s664_s1 + $0xb0] sm:$0xff]   ;;  %v509_v31 = vld [vmem:[%s664_s1 + $0xb8] sm:$0xff]  }
   0xd   :  { %461 = vmatpush3.bf16.msra.mxu1 %v489_v11  ;;  %440 = vmatprep.subr.bf16.mxu0 %v490_v12  ;;  %v510_v32 = vld [vmem:[%s665_s0] ss:$16 sps:$4 sm:$0xff]   ;;  %v512_v33 = vld [vmem:[%s665_s0 + $0x4] ss:$16 sps:$4 sm:$0xff]   ;;  %v513_v34 = vld [vmem:[%s665_s0 + $0x8] ss:$16 sps:$4 sm:$0xff]  }
   0xe   :  { %462 = vmatprep.subr.bf16.mxu1 %v491_v13  ;;  %v515_v35 = vld [vmem:[%s665_s0 + $0xc] ss:$16 sps:$4 sm:$0xff]   ;;  %337 = vmatprep.mubr.bf16.mxu0 %v512_v33 }
   0xf   :  { %378 = vmatprep.mubr.bf16.mxu1 %v515_v35 }
  0x10   :  { %441 = vmatpush3.bf16.msra.mxu0 %v492_v14 }
  0x11   :  { %463 = vmatpush3.bf16.msra.mxu1 %v493_v15  ;;  %442 = vmatprep.subr.bf16.mxu0 %v494_v16 }
  0x12   :  { %464 = vmatprep.subr.bf16.mxu1 %v495_v17 }
  0x14   :  { %443 = vmatpush3.bf16.msra.mxu0 %v496_v18 }
  0x15   :  { %465 = vmatpush3.bf16.msra.mxu1 %v497_v19  ;;  %444 = vmatprep.subr.bf16.mxu0 %v498_v20 }
  0x16   :  { %466 = vmatprep.subr.bf16.mxu1 %v499_v21 }
  0x18   :  { %445 = vmatpush3.bf16.msra.mxu0 %v500_v22 }
  0x19   :  { %467 = vmatpush3.bf16.msra.mxu1 %v501_v23  ;;  %446 = vmatprep.subr.bf16.mxu0 %v502_v24 }
  0x1a   :  { %468 = vmatprep.subr.bf16.mxu1 %v503_v25 }
  0x1c   :  { %447 = vmatpush3.bf16.msra.mxu0 %v504_v26 }
  0x1d   :  { %469 = vmatpush3.bf16.msra.mxu1 %v505_v27  ;;  %448 = vmatprep.subr.bf16.mxu0 %v506_v28 }
  0x1e   :  { %470 = vmatprep.subr.bf16.mxu1 %v507_v29 }
  0x20   :  { %449 = vmatpush3.bf16.msra.mxu0 %v508_v30 }
  0x21   :  { %471 = vmatpush3.bf16.msra.mxu1 %v509_v31 }
  0x23   :  { %338 = vmatmul.mubr.bf16.vlgmr.msra.gmra.mrb[0].mxu0 %v510_v32 }
  0x24   :  { %379 = vmatmul.mubr.bf16.vlgmr.msra.gmra.mrb[0].mxu1 %v513_v34 }
  0xf6   :  { %v450_v36 = vpop.f32.mrb[0].mxu0 }
  0xf7   :  { %v472_v37 = vpop.f32.mrb[0].mxu1  ;;  %v451_v39 = vpop.f32.mrb[1].mxu0 }
  0xf8   :  { %v452_v40 = vadd.f32 %v451_v39, %v450_v36  ;;  %v473_v41 = vpop.f32.mrb[1].mxu1  ;;  %v453_v42 = vpop.f32.mrb[2].mxu0 }
  0xf9   :  { %v474_v43 = vadd.f32 %v473_v41, %v472_v37  ;;  %v475_v44 = vpop.f32.mrb[2].mxu1  ;;  %v454_v45 = vpop.f32.mrb[3].mxu0 }
  0xfa   :  { %v340_v46 = vadd.f32 %v452_v40, %v397_v38  ;;  %v455_v47 = vadd.f32 %v454_v45, %v453_v42  ;;  %v476_v48 = vpop.f32.mrb[3].mxu1 }
  0xfb   :  { %v477_v50 = vadd.f32 %v476_v48, %v475_v44 }
  0xfc   :  { %v381_v51 = vadd.f32 %v474_v43, %v340_v46  ;;  %v343_v52 = vadd.f32 %v455_v47, %v397_v38 }
  0xfe   :  { %v389_v54 = vadd.f32 %v387_v49, %v381_v51  ;;  %v384_v55 = vadd.f32 %v477_v50, %v343_v52 }
 0x100   :  { %391 = vst [vmem:[%s668_s4] sm:$0xff] %v389_v54  ;;  %v390_v56 = vadd.f32 %v388_v53, %v384_v55 }
 0x102   :  { %392 = vst [vmem:[%s668_s4 + $0x8] sm:$0xff] %v390_v56 }

</bundles_post_ra>
